<compile_context>
chip_gen: v5e
topology: v5e:2x2
jax: 0.10.0
libtpu: 0.0.40
codegen_flags: <defaults>
</compile_context>

<pallas_src>
import jax
import jax.numpy as jnp
from jax.experimental import pallas as pl
from jax.experimental.pallas import tpu as pltpu

K_IN = 28 * 28          # 784
K_PAD = 896             # 7 * 128
H = 128                 # lane-dense hidden/output width
NUM_CLASSES = 10
NEG_BIG = -1e30         # pad bias for fc4 -> exp underflows to exactly 0 in f32


def mlp_kernel(x_ref, w1_ref, w234_ref, b_ref, o_ref):
    # x tile is already bf16; all matmuls accumulate in f32 on the MXU.
    x = x_ref[...]

    b = b_ref[...]                                   # (4, 128) f32, resident

    # fc1 + relu
    h = jnp.dot(x, w1_ref[...], preferred_element_type=jnp.float32) + b[0:1, :]
    h = jnp.maximum(h, 0.0).astype(jnp.bfloat16)
    # fc2 + relu
    h = jnp.dot(h, w234_ref[0], preferred_element_type=jnp.float32) + b[1:2, :]
    h = jnp.maximum(h, 0.0).astype(jnp.bfloat16)
    # fc3 + relu
    h = jnp.dot(h, w234_ref[1], preferred_element_type=jnp.float32) + b[2:3, :]
    h = jnp.maximum(h, 0.0).astype(jnp.bfloat16)
    # fc4 (padded columns get bias -1e30 -> do not perturb log-sum-exp)
    logits = jnp.dot(h, w234_ref[2], preferred_element_type=jnp.float32) + b[3:4, :]

    # numerically-stable log_softmax over the last axis (f32)
    m = jnp.max(logits, axis=-1, keepdims=True)
    shifted = logits - m
    lse = jnp.log(jnp.sum(jnp.exp(shifted), axis=-1, keepdims=True))
    o_ref[...] = shifted - lse


def mlp_forward(x, w1p, w234, biases, *, tm=128):
    B = x.shape[0]
    n_blk = pl.cdiv(B, tm)
    Bp = n_blk * tm
    # pad batch to a tile multiple, pad K 784 -> 896, and feed the MXU bf16 inputs
    xp = jnp.zeros((Bp, K_PAD), jnp.float32).at[:B, :K_IN].set(x).astype(jnp.bfloat16)

    out = pl.pallas_call(
        mlp_kernel,
        out_shape=jax.ShapeDtypeStruct((Bp, H), jnp.float32),
        grid_spec=pltpu.PrefetchScalarGridSpec(
            num_scalar_prefetch=0,
            grid=(n_blk,),
            in_specs=[
                pl.BlockSpec((tm, K_PAD), lambda i: (i, 0)),        # x tile (pipelined)
                pl.BlockSpec((K_PAD, H), lambda i: (0, 0)),         # w1, resident
                pl.BlockSpec((3, H, H), lambda i: (0, 0, 0)),       # w2/w3/w4 packed, resident
                pl.BlockSpec((4, H), lambda i: (0, 0)),             # biases packed, resident
            ],
            out_specs=pl.BlockSpec((tm, H), lambda i: (i, 0)),      # lane-dense output slab
        ),
        compiler_params=pltpu.CompilerParams(
            dimension_semantics=("parallel",)),
    )(xp, w1p, w234, biases)

    return out[:B, :NUM_CLASSES]


def init_params(key):
    # Deterministic synthetic parameters (PyTorch-like uniform fan_in init), f32 masters.
    dims = [(K_IN, 128), (128, 64), (64, 32), (32, NUM_CLASSES)]
    ws, bs = [], []
    for fan_in, fan_out in dims:
        kw, kb, key = jax.random.split(key, 3)
        bound = 1.0 / (fan_in ** 0.5)
        ws.append(jax.random.uniform(kw, (fan_in, fan_out), jnp.float32, -bound, bound))
        bs.append(jax.random.uniform(kb, (fan_out,), jnp.float32, -bound, bound))
    return ws, bs


def pack_params(ws, bs):
    """Pad to lane-dense shapes, pack the small layers, cast weights to bf16."""
    w1, w2, w3, w4 = ws
    b1, b2, b3, b4 = bs

    # fc1: pad K 784 -> 896 with zeros (output dim already 128)
    w1p = jnp.zeros((K_PAD, H), jnp.float32).at[:K_IN, :].set(w1).astype(jnp.bfloat16)

    # fc2/fc3/fc4: zero-pad both dims to 128 and stack into one buffer
    def pad_w(w):
        return jnp.zeros((H, H), jnp.float32).at[:w.shape[0], :w.shape[1]].set(w)

    w234 = jnp.stack([pad_w(w2), pad_w(w3), pad_w(w4)]).astype(jnp.bfloat16)

    # biases: zero-pad (ReLU preserves zeros); fc4 padded with -1e30 so padded logits
    # vanish in the log-sum-exp.  Kept in f32 — bias add / softmax run in f32.
    def pad_b(b, fill=0.0):
        return jnp.full((H,), fill, jnp.float32).at[:b.shape[0]].set(b)

    biases = jnp.stack([pad_b(b1), pad_b(b2), pad_b(b3), pad_b(b4, fill=NEG_BIG)])
    return w1p, w234, biases


def reference_forward(x, w1p, w234, biases):
    # Mirrors the kernel numerics (bf16 MXU inputs, f32 accumulation) in plain JAX.
    xp = jnp.zeros((x.shape[0], K_PAD), jnp.float32).at[:, :K_IN].set(x).astype(jnp.bfloat16)
    h = jnp.dot(xp, w1p, preferred_element_type=jnp.float32) + biases[0:1]
    h = jnp.maximum(h, 0.0).astype(jnp.bfloat16)
    h = jnp.dot(h, w234[0], preferred_element_type=jnp.float32) + biases[1:2]
    h = jnp.maximum(h, 0.0).astype(jnp.bfloat16)
    h = jnp.dot(h, w234[1], preferred_element_type=jnp.float32) + biases[2:3]
    h = jnp.maximum(h, 0.0).astype(jnp.bfloat16)
    logits = jnp.dot(h, w234[2], preferred_element_type=jnp.float32) + biases[3:4]
    return jax.nn.log_softmax(logits[:, :NUM_CLASSES], axis=1)


if __name__ == "__main__":
    key = jax.random.PRNGKey(0)
    kx, kp = jax.random.split(key)

    B = 8
    x = jax.random.normal(kx, (B, K_IN), jnp.float32)
    ws, bs = init_params(kp)
    w1p, w234, biases = pack_params(ws, bs)

    out = mlp_forward(x, w1p, w234, biases)
    out = jax.block_until_ready(out)

    ref = reference_forward(x, w1p, w234, biases)
    assert out.shape == (B, NUM_CLASSES)
    assert jnp.allclose(out, ref, atol=1e-2, rtol=1e-2)
    print("KERNEL_OK")
</pallas_src>

<mosaic_0001>
module attributes {stable_mosaic.version = 11 : i64} {
  func.func @mlp_kernel(%arg0: i32, %arg1: memref<128x896xbf16, #tpu.memory_space<vmem>>, %arg2: memref<896x128xbf16, #tpu.memory_space<vmem>>, %arg3: memref<3x128x128xbf16, #tpu.memory_space<vmem>>, %arg4: memref<4x128xf32, #tpu.memory_space<vmem>>, %arg5: memref<128x128xf32, #tpu.memory_space<vmem>>) attributes {dimension_semantics = [#tpu.dimension_semantics<parallel>], iteration_bounds = array<i64: 1>, scalar_prefetch = 0 : i64, scratch_operands = 0 : i64, tpu.core_type = #tpu.core_type<tc>, window_params = [{transform_indices = @transform_0, window_bounds = array<i64: 128, 896>}, {pipeline_mode = #tpu.pipeline_mode<synchronous>, transform_indices = @transform_1, window_bounds = array<i64: 896, 128>}, {pipeline_mode = #tpu.pipeline_mode<synchronous>, transform_indices = @transform_2, window_bounds = array<i64: 3, 128, 128>}, {pipeline_mode = #tpu.pipeline_mode<synchronous>, transform_indices = @transform_3, window_bounds = array<i64: 4, 128>}, {transform_indices = @transform_4, window_bounds = array<i64: 128, 128>}]} {
    %c0 = arith.constant 0 : index
    %c0_0 = arith.constant 0 : index
    %0 = vector.load %arg1[%c0, %c0_0] : memref<128x896xbf16, #tpu.memory_space<vmem>>, vector<128x896xbf16>
    %c0_1 = arith.constant 0 : index
    %c0_2 = arith.constant 0 : index
    %1 = vector.load %arg4[%c0_1, %c0_2] : memref<4x128xf32, #tpu.memory_space<vmem>>, vector<4x128xf32>
    %c0_3 = arith.constant 0 : index
    %c0_4 = arith.constant 0 : index
    %2 = vector.load %arg2[%c0_3, %c0_4] : memref<896x128xbf16, #tpu.memory_space<vmem>>, vector<896x128xbf16>
    %cst = arith.constant dense<0.000000e+00> : vector<128x128xf32>
    %3 = tpu.matmul %0, %2, %cst {dimension_numbers = #tpu.dot_dimension_numbers<[1], [0], [0], [1], [0, 0, 1, 1], [], []>} : vector<128x896xbf16>, vector<896x128xbf16>, vector<128x128xf32> -> vector<128x128xf32>
    %4 = vector.extract_strided_slice %1 {offsets = [0, 0], sizes = [1, 128], strides = [1, 1]} : vector<4x128xf32> to vector<1x128xf32>
    %5 = vector.broadcast %4 : vector<1x128xf32> to vector<128x128xf32>
    %6 = arith.addf %3, %5 : vector<128x128xf32>
    %cst_5 = arith.constant 0.000000e+00 : f32
    %7 = vector.broadcast %cst_5 : f32 to vector<128x128xf32>
    %8 = arith.maximumf %6, %7 : vector<128x128xf32>
    %9 = arith.truncf %8 : vector<128x128xf32> to vector<128x128xbf16>
    %c0_6 = arith.constant 0 : index
    %c0_7 = arith.constant 0 : index
    %c0_8 = arith.constant 0 : index
    %10 = vector.load %arg3[%c0_6, %c0_7, %c0_8] : memref<3x128x128xbf16, #tpu.memory_space<vmem>>, vector<1x128x128xbf16>
    %11 = vector.shape_cast %10 : vector<1x128x128xbf16> to vector<128x128xbf16>
    %cst_9 = arith.constant dense<0.000000e+00> : vector<128x128xf32>
    %12 = tpu.matmul %9, %11, %cst_9 {dimension_numbers = #tpu.dot_dimension_numbers<[1], [0], [0], [1], [0, 0, 1, 1], [], []>} : vector<128x128xbf16>, vector<128x128xbf16>, vector<128x128xf32> -> vector<128x128xf32>
    %13 = vector.extract_strided_slice %1 {offsets = [1, 0], sizes = [1, 128], strides = [1, 1]} : vector<4x128xf32> to vector<1x128xf32>
    %14 = vector.broadcast %13 : vector<1x128xf32> to vector<128x128xf32>
    %15 = arith.addf %12, %14 : vector<128x128xf32>
    %cst_10 = arith.constant 0.000000e+00 : f32
    %16 = vector.broadcast %cst_10 : f32 to vector<128x128xf32>
    %17 = arith.maximumf %15, %16 : vector<128x128xf32>
    %18 = arith.truncf %17 : vector<128x128xf32> to vector<128x128xbf16>
    %c1 = arith.constant 1 : index
    %c0_11 = arith.constant 0 : index
    %c0_12 = arith.constant 0 : index
    %19 = vector.load %arg3[%c1, %c0_11, %c0_12] : memref<3x128x128xbf16, #tpu.memory_space<vmem>>, vector<1x128x128xbf16>
    %20 = vector.shape_cast %19 : vector<1x128x128xbf16> to vector<128x128xbf16>
    %cst_13 = arith.constant dense<0.000000e+00> : vector<128x128xf32>
    %21 = tpu.matmul %18, %20, %cst_13 {dimension_numbers = #tpu.dot_dimension_numbers<[1], [0], [0], [1], [0, 0, 1, 1], [], []>} : vector<128x128xbf16>, vector<128x128xbf16>, vector<128x128xf32> -> vector<128x128xf32>
    %22 = vector.extract_strided_slice %1 {offsets = [2, 0], sizes = [1, 128], strides = [1, 1]} : vector<4x128xf32> to vector<1x128xf32>
    %23 = vector.broadcast %22 : vector<1x128xf32> to vector<128x128xf32>
    %24 = arith.addf %21, %23 : vector<128x128xf32>
    %cst_14 = arith.constant 0.000000e+00 : f32
    %25 = vector.broadcast %cst_14 : f32 to vector<128x128xf32>
    %26 = arith.maximumf %24, %25 : vector<128x128xf32>
    %27 = arith.truncf %26 : vector<128x128xf32> to vector<128x128xbf16>
    %c2 = arith.constant 2 : index
    %c0_15 = arith.constant 0 : index
    %c0_16 = arith.constant 0 : index
    %28 = vector.load %arg3[%c2, %c0_15, %c0_16] : memref<3x128x128xbf16, #tpu.memory_space<vmem>>, vector<1x128x128xbf16>
    %29 = vector.shape_cast %28 : vector<1x128x128xbf16> to vector<128x128xbf16>
    %cst_17 = arith.constant dense<0.000000e+00> : vector<128x128xf32>
    %30 = tpu.matmul %27, %29, %cst_17 {dimension_numbers = #tpu.dot_dimension_numbers<[1], [0], [0], [1], [0, 0, 1, 1], [], []>} : vector<128x128xbf16>, vector<128x128xbf16>, vector<128x128xf32> -> vector<128x128xf32>
    %31 = vector.extract_strided_slice %1 {offsets = [3, 0], sizes = [1, 128], strides = [1, 1]} : vector<4x128xf32> to vector<1x128xf32>
    %32 = vector.broadcast %31 : vector<1x128xf32> to vector<128x128xf32>
    %33 = arith.addf %30, %32 : vector<128x128xf32>
    %cst_18 = arith.constant dense<0xFF800000> : vector<128xf32>
    %34 = vector.multi_reduction <maximumf>, %33, %cst_18 [1] : vector<128x128xf32> to vector<128xf32>
    %35 = vector.shape_cast %34 : vector<128xf32> to vector<128x1xf32>
    %36 = vector.broadcast %35 : vector<128x1xf32> to vector<128x128xf32>
    %37 = arith.subf %33, %36 : vector<128x128xf32>
    %38 = math.exp %37 : vector<128x128xf32>
    %cst_19 = arith.constant dense<0.000000e+00> : vector<128xf32>
    %39 = vector.multi_reduction <add>, %38, %cst_19 [1] : vector<128x128xf32> to vector<128xf32>
    %40 = vector.shape_cast %39 : vector<128xf32> to vector<128x1xf32>
    %41 = math.log %40 : vector<128x1xf32>
    %42 = vector.broadcast %41 : vector<128x1xf32> to vector<128x128xf32>
    %43 = arith.subf %37, %42 : vector<128x128xf32>
    %c0_20 = arith.constant 0 : index
    %c0_21 = arith.constant 0 : index
    %44 = vector.load %arg5[%c0_20, %c0_21] : memref<128x128xf32, #tpu.memory_space<vmem>>, vector<128x128xf32>
    tpu.vector_store %arg5[%c0_20, %c0_21], %43 {strides = array<i32>} : memref<128x128xf32, #tpu.memory_space<vmem>>, vector<128x128xf32>,
    return
  }
  func.func @transform_0(%arg0: i32) -> (i32, i32) {
    %c0_i32 = arith.constant 0 : i32
    %c0_i32_0 = arith.constant 0 : i32
    return %arg0, %c0_i32 : i32, i32
  }
  func.func @transform_1(%arg0: i32) -> (i32, i32) {
    %c0_i32 = arith.constant 0 : i32
    %c0_i32_0 = arith.constant 0 : i32
    %c0_i32_1 = arith.constant 0 : i32
    return %c0_i32, %c0_i32_0 : i32, i32
  }
  func.func @transform_2(%arg0: i32) -> (i32, i32, i32) {
    %c0_i32 = arith.constant 0 : i32
    %c0_i32_0 = arith.constant 0 : i32
    %c0_i32_1 = arith.constant 0 : i32
    %c0_i32_2 = arith.constant 0 : i32
    return %c0_i32, %c0_i32_0, %c0_i32_1 : i32, i32, i32
  }
  func.func @transform_3(%arg0: i32) -> (i32, i32) {
    %c0_i32 = arith.constant 0 : i32
    %c0_i32_0 = arith.constant 0 : i32
    %c0_i32_1 = arith.constant 0 : i32
    return %c0_i32, %c0_i32_0 : i32, i32
  }
  func.func @transform_4(%arg0: i32) -> (i32, i32) {
    %c0_i32 = arith.constant 0 : i32
    %c0_i32_0 = arith.constant 0 : i32
    return %arg0, %c0_i32 : i32, i32
  }
}

</mosaic_0001>

<bundles_post_ra>
// kernel: tpu_custom_call.1
= control target key start
LH: loop header
LB: loop body
LE: loop exit
PB: predicated region body
PF: predicated region fallthrough
CT: control target
= control target key end

     0   :  { %9 = vsyncpa [#allocation3], 0  ;;  %s3047_s0 = inlined_call_operand.hbm [shape: bf16[128,896], index: 0, kind: input, shape index: {}]   ;;  %s3048_s1 = inlined_call_operand.hbm [shape: bf16[896,128], index: 1, kind: input, shape index: {}]   ;;  %s3049_s2 = inlined_call_operand.hbm [shape: bf16[3,128,128], index: 2, kind: input, shape index: {}]   ;;  %s3050_s3 = inlined_call_operand.hbm [shape: f32[4,128], index: 3, kind: input, shape index: {}]   ;;  %s3051_s4 = inlined_call_operand.hbm [shape: f32[128,128], index: 4, kind: output, shape index: {}]  }
   0x1   :  { %10 = vsyncpa [#allocation6], 0 }
   0x2   :  { %11 = vsyncpa [#allocation9], 0  ;;  %s30_s17 = sshll.u32 %s3048_s1, 4  ;;  %s31_s17 = int_to_ptr.hbm [resolvable:$true] %s30_s17 }
   0x3   :  { %12 = vsyncpa [#allocation4], 0  ;;  %s2737_s18 = smov [#allocation5]   ;;  %s17_s22 = sshll.u32 %s3047_s0, 4  ;;  %s18_s22 = int_to_ptr.hbm [resolvable:$true] %s17_s22 }
   0x4   :  { %s32_s19 = sshll.u32 %s2737_s18, 4  ;;  %s2738_s23 = smov 64   ;;  %s33_s19 = int_to_ptr.vmem [resolvable:$true] %s32_s19 }
   0x5   :  { %s2739_s24 = smov 4   ;;  %s2740_s25 = smov [#allocation2]  }
   0x6   :  { %38 = dma.hbm_to_vmem [thread:$0]  %s31_s17, 7168, %s33_s19, [#allocation6], %s2738_s23, %s2738_s23, %s2739_s24  }
   0x7   :  { %s19_s26 = sshll.u32 %s2740_s25, 4  ;;  %s2741_s27 = smov 448   ;;  %s20_s26 = int_to_ptr.vmem [resolvable:$true] %s19_s26 }
   0x8   :  { %s2742_s28 = smov 28   ;;  %s43_s30 = sshll.u32 %s3049_s2, 4  ;;  %s44_s30 = int_to_ptr.hbm [resolvable:$true] %s43_s30 }
   0x9   :  { %25 = dma.hbm_to_vmem [thread:$0]  %s18_s22, 7168, %s20_s26, [#allocation3], %s2741_s27, %s2741_s27, %s2742_s28  }
   0xa   :  { %s2743_s5 = smov [#allocation7]   ;;  %s57_s8 = sshll.u32 %s3050_s3, 4  ;;  %s58_s8 = int_to_ptr.hbm [resolvable:$true] %s57_s8 }
   0xb   :  { %s45_s6 = sshll.u32 %s2743_s5, 4  ;;  %s2744_s9 = smov [#allocation8]   ;;  %s46_s6 = int_to_ptr.vmem [resolvable:$true] %s45_s6 }
   0xc   :  { %51 = dma.hbm_to_vmem [thread:$0]  %s44_s30, 3072, %s46_s6, [#allocation6], %s2738_s23, %s2738_s23, %s2739_s24  }
   0xd   :  { %s59_s10 = sshll.u32 %s2744_s9, 4  ;;  %s60_s10 = int_to_ptr.vmem [resolvable:$true] %s59_s10 }
   0xe   :  { %62 = dma.hbm_to_vmem [thread:$0]  %s58_s8, 64, %s60_s10, [#allocation9]  }
   0xf   :  { %2729 = dma.done.wait [#allocation3], 7168  }
  0x10   :  { %2730 = vsyncadd [#allocation3], 4294960128 }
  0x11   :  { %2731 = dma.done.wait [#allocation6], 10240  }
  0x12   :  { %2732 = vsyncadd [#allocation6], 4294957056 }
  0x13   :  { %2733 = dma.done.wait [#allocation9], 64  }
  0x14   :  { %2734 = vsyncadd [#allocation9], 4294967232  ;;  %v2444_v0 = vld [vmem:[#allocation5 + $0x38] sm:$0xff]  ;;  %v2443_v2 = vld [vmem:[#allocation5 + $0x30] sm:$0xff]  ;;  %s2745_s2 = smov [#allocation10]   ;;  %s1822_s13 = sshll.u32 %s3051_s4, 4  ;;  %s1823_s13 = int_to_ptr.hbm [resolvable:$true] %s1822_s13 }
  0x15   :  { %v2452_v1 = vld [vmem:[#allocation5 + $0x78] sm:$0xff]  ;;  %2517 = vmatpush.bf16.msra.mxu2 %v2444_v0  ;;  %v2451_v3 = vld [vmem:[#allocation5 + $0x70] sm:$0xff]  ;;  %881 = vmatpush.bf16.msra.mxu0 %v2444_v0  ;;  %v2442_v4 = vld [vmem:[#allocation5 + $0x28] sm:$0xff]  ;;  %s1820_s3 = sshll.u32 %s2745_s2, 4  ;;  %s2746_s14 = smov 128   ;;  %s1821_s3 = int_to_ptr.vmem [resolvable:$true] %s1820_s3 }
  0x16   :  { %2525 = vmatpush.bf16.msra.mxu3 %v2452_v1  ;;  %930 = vmatpush.bf16.msra.mxu1 %v2452_v1  ;;  %v2450_v5 = vld [vmem:[#allocation5 + $0x68] sm:$0xff]  ;;  %v2441_v6 = vld [vmem:[#allocation5 + $0x20] sm:$0xff]  ;;  %v2440_v8 = vld [vmem:[#allocation5 + $0x18] sm:$0xff]  ;;  %s2747_s15 = smov 8  }
  0x17   :  { %v2449_v7 = vld [vmem:[#allocation5 + $0x60] sm:$0xff]  ;;  %v2448_v9 = vld [vmem:[#allocation5 + $0x58] sm:$0xff]  ;;  %v2439_v10 = vld [vmem:[#allocation5 + $0x10] sm:$0xff] }
  0x18   :  { %v2447_v11 = vld [vmem:[#allocation5 + $0x50] sm:$0xff]  ;;  %v2438_v12 = vld [vmem:[#allocation5 + $0x8] sm:$0xff]  ;;  %v2437_v14 = vld [vmem:[#allocation5] sm:$0xff] }
  0x19   :  { %2518 = vmatpush.bf16.msra.mxu2 %v2443_v2  ;;  %882 = vmatpush.bf16.msra.mxu0 %v2443_v2  ;;  %v2446_v13 = vld [vmem:[#allocation5 + $0x48] sm:$0xff]  ;;  %v2445_v15 = vld [vmem:[#allocation5 + $0x40] sm:$0xff]  ;;  %v2412_v17 = vld [vmem:[#allocation2 + $0xf8] sm:$0xf0] }
  0x1a   :  { %2526 = vmatpush.bf16.msra.mxu3 %v2451_v3  ;;  %931 = vmatpush.bf16.msra.mxu1 %v2451_v3  ;;  %v1951_v16 = vld [vmem:[#allocation2 + $0xe0] sm:$0xf]  ;;  %v2409_v18 = vld [vmem:[#allocation2 + $0xe4] sm:$0xf]  ;;  %v2460_v20 = vld [vmem:[#allocation5 + $0xb8] sm:$0xff] }
  0x1b   :  { %v1953_v19 = vld [vmem:[#allocation2 + $0xfc] sm:$0xf0]  ;;  %v2384_v22 = vld [vmem:[#allocation2 + $0x18] sm:$0xf0]  ;;  %v2381_v23 = vld [vmem:[#allocation2 + $0x4] sm:$0xf]  ;;  %v1952_v25 = vor.u32 %v2412_v17, %v1951_v16 }
  0x1c   :  { %v1839_v21 = vld [vmem:[#allocation2] sm:$0xf]  ;;  %v1956_v26 = vor.u32 %v2409_v18, %v1953_v19  ;;  %v2459_v28 = vld [vmem:[#allocation5 + $0xb0] sm:$0xff]  ;;  %v2468_v30 = vld [vmem:[#allocation5 + $0xf8] sm:$0xff] }
  0x1d   :  { %2519 = vmatpush.bf16.msra.mxu2 %v2442_v4  ;;  %883 = vmatpush.bf16.msra.mxu0 %v2442_v4  ;;  %v1841_v24 = vld [vmem:[#allocation2 + $0x1c] sm:$0xf0]  ;;  %v1840_v27 = vor.u32 %v2384_v22, %v1839_v21  ;;  %v2458_v31 = vld [vmem:[#allocation5 + $0xa8] sm:$0xff]  ;;  %v2476_v32 = vld [vmem:[#allocation5 + $0x138] sm:$0xff] }
  0x1e   :  { %2527 = vmatpush.bf16.msra.mxu3 %v2450_v5  ;;  %932 = vmatpush.bf16.msra.mxu1 %v2450_v5  ;;  %v1844_v29 = vor.u32 %v2381_v23, %v1841_v24  ;;  %v2467_v33 = vld [vmem:[#allocation5 + $0xf0] sm:$0xff]  ;;  %v2484_v34 = vld [vmem:[#allocation5 + $0x178] sm:$0xff]  ;;  %v2457_v36 = vld [vmem:[#allocation5 + $0xa0] sm:$0xff] }
  0x1f   :  { %v2475_v35 = vld [vmem:[#allocation5 + $0x130] sm:$0xff]  ;;  %v2466_v37 = vld [vmem:[#allocation5 + $0xe8] sm:$0xff]  ;;  %v1979_v38 = vld [vmem:[#allocation2 + $0x118] sm:$0xf] }
  0x20   :  { %v2419_v39 = vld [vmem:[#allocation2 + $0x130] sm:$0xf0]  ;;  %v2416_v40 = vld [vmem:[#allocation2 + $0x11c] sm:$0xf]  ;;  %v1981_v41 = vld [vmem:[#allocation2 + $0x134] sm:$0xf0] }
  0x21   :  { %2520 = vmatpush.bf16.msra.mxu2 %v2441_v6  ;;  %884 = vmatpush.bf16.msra.mxu0 %v2441_v6  ;;  %v1867_v42 = vld [vmem:[#allocation2 + $0x38] sm:$0xf]  ;;  %v2391_v43 = vld [vmem:[#allocation2 + $0x50] sm:$0xf0]  ;;  %v2388_v45 = vld [vmem:[#allocation2 + $0x3c] sm:$0xf]  ;;  %v1980_v48 = vor.u32 %v2419_v39, %v1979_v38  ;;  %v1984_v49 = vor.u32 %v2416_v40, %v1981_v41 }
  0x22   :  { %2528 = vmatpush.bf16.msra.mxu3 %v2449_v7  ;;  %933 = vmatpush.bf16.msra.mxu1 %v2449_v7  ;;  %v2456_v44 = vld [vmem:[#allocation5 + $0x98] sm:$0xff]  ;;  %v2465_v47 = vld [vmem:[#allocation5 + $0xe0] sm:$0xff]  ;;  %v1868_v50 = vor.u32 %v2391_v43, %v1867_v42  ;;  %v2455_v52 = vld [vmem:[#allocation5 + $0x90] sm:$0xff] }
  0x23   :  { %v1869_v46 = vld [vmem:[#allocation2 + $0x54] sm:$0xf0]  ;;  %v2483_v53 = vld [vmem:[#allocation5 + $0x170] sm:$0xff]  ;;  %v2474_v55 = vld [vmem:[#allocation5 + $0x128] sm:$0xff] }
  0x24   :  { %v1872_v51 = vor.u32 %v2388_v45, %v1869_v46  ;;  %v2464_v54 = vld [vmem:[#allocation5 + $0xd8] sm:$0xff]  ;;  %v2482_v56 = vld [vmem:[#allocation5 + $0x168] sm:$0xff]  ;;  %v2463_v58 = vld [vmem:[#allocation5 + $0xd0] sm:$0xff] }
  0x25   :  { %2521 = vmatpush.bf16.msra.mxu2 %v2440_v8  ;;  %885 = vmatpush.bf16.msra.mxu0 %v2440_v8  ;;  %v2454_v57 = vld [vmem:[#allocation5 + $0x88] sm:$0xff]  ;;  %v2473_v59 = vld [vmem:[#allocation5 + $0x120] sm:$0xff]  ;;  %v2472_v63 = vld [vmem:[#allocation5 + $0x118] sm:$0xff] }
  0x26   :  { %2529 = vmatpush.bf16.msra.mxu3 %v2448_v9  ;;  %934 = vmatpush.bf16.msra.mxu1 %v2448_v9  ;;  %v2481_v60 = vld [vmem:[#allocation5 + $0x160] sm:$0xff]  ;;  %v2462_v62 = vld [vmem:[#allocation5 + $0xc8] sm:$0xff]  ;;  %v2007_v0 = vld [vmem:[#allocation2 + $0x150] sm:$0xf] }
  0x27   :  { %v2453_v61 = vld [vmem:[#allocation5 + $0x80] sm:$0xff]  ;;  %v2426_v1 = vld [vmem:[#allocation2 + $0x168] sm:$0xf0]  ;;  %v2423_v2 = vld [vmem:[#allocation2 + $0x154] sm:$0xf] }
  0x28   :  { %v2009_v3 = vld [vmem:[#allocation2 + $0x16c] sm:$0xf0]  ;;  %v2480_v4 = vld [vmem:[#allocation5 + $0x158] sm:$0xff]  ;;  %v2398_v6 = vld [vmem:[#allocation2 + $0x88] sm:$0xf0] }
  0x29   :  { %2522 = vmatpush.bf16.msra.mxu2 %v2439_v10  ;;  %886 = vmatpush.bf16.msra.mxu0 %v2439_v10  ;;  %v1895_v5 = vld [vmem:[#allocation2 + $0x70] sm:$0xf]  ;;  %v2395_v7 = vld [vmem:[#allocation2 + $0x74] sm:$0xf]  ;;  %v2461_v9 = vld [vmem:[#allocation5 + $0xc0] sm:$0xff] }
  0x2a   :  { %2530 = vmatpush.bf16.msra.mxu3 %v2447_v11  ;;  %935 = vmatpush.bf16.msra.mxu1 %v2447_v11  ;;  %v1897_v8 = vld [vmem:[#allocation2 + $0x8c] sm:$0xf0]  ;;  %v2008_v11 = vor.u32 %v2426_v1, %v2007_v0  ;;  %v2492_v16 = vld [vmem:[#allocation5 + $0x1b8] sm:$0xff]  ;;  %v2470_v17 = vld [vmem:[#allocation5 + $0x108] sm:$0xff] }
  0x2b   :  { %v2471_v10 = vld [vmem:[#allocation5 + $0x110] sm:$0xff]  ;;  %v2478_v18 = vld [vmem:[#allocation5 + $0x148] sm:$0xff]  ;;  %v2469_v19 = vld [vmem:[#allocation5 + $0x100] sm:$0xff] }
  0x2c   :  { %v2035_v21 = vld [vmem:[#allocation2 + $0x188] sm:$0xf]  ;;  %v2433_v22 = vld [vmem:[#allocation2 + $0x1a0] sm:$0xf0]  ;;  %v2430_v23 = vld [vmem:[#allocation2 + $0x18c] sm:$0xf] }
  0x2d   :  { %2523 = vmatpush.bf16.msra.mxu2 %v2438_v12  ;;  %887 = vmatpush.bf16.msra.mxu0 %v2438_v12  ;;  %v2012_v12 = vor.u32 %v2423_v2, %v2009_v3  ;;  %v2037_v24 = vld [vmem:[#allocation2 + $0x1a4] sm:$0xf0]  ;;  %v1855_v38 = vld [vmem:[#allocation2 + $0x10] sm:$0xf]  ;;  %v2386_v39 = vld [vmem:[#allocation2 + $0x28] sm:$0xf0] }
  0x2e   :  { %2531 = vmatpush.bf16.msra.mxu3 %v2446_v13  ;;  %936 = vmatpush.bf16.msra.mxu1 %v2446_v13  ;;  %v1896_v13 = vor.u32 %v2398_v6, %v1895_v5  ;;  %v2383_v40 = vld [vmem:[#allocation2 + $0x14] sm:$0xf]  ;;  %v1857_v41 = vld [vmem:[#allocation2 + $0x2c] sm:$0xf0]  ;;  %v2490_v46 = vld [vmem:[#allocation5 + $0x1a8] sm:$0xff] }
  0x2f   :  { %v1860_v45 = vor.u32 %v2383_v40, %v1857_v41  ;;  %v1911_v0 = vld [vmem:[#allocation2 + $0x80] sm:$0xf]  ;;  %v2400_v1 = vld [vmem:[#allocation2 + $0x98] sm:$0xf0]  ;;  %v2397_v2 = vld [vmem:[#allocation2 + $0x84] sm:$0xf] }
  0x30   :  { %v1913_v3 = vld [vmem:[#allocation2 + $0x9c] sm:$0xf0]  ;;  %v1912_v6 = vor.u32 %v2400_v1, %v1911_v0 }
  0x31   :  { %2524 = vmatpush.bf16.msra.mxu2 %v2437_v14  ;;  %888 = vmatpush.bf16.msra.mxu0 %v2437_v14  ;;  %v1900_v14 = vor.u32 %v2395_v7, %v1897_v8  ;;  %v1916_v7 = vor.u32 %v2397_v2, %v1913_v3  ;;  %v2488_v8 = vld [vmem:[#allocation5 + $0x198] sm:$0xff]  ;;  %v2485_v1 = vld [vmem:[#allocation5 + $0x180] sm:$0xff] }
  0x32   :  { %2532 = vmatpush.bf16.msra.mxu3 %v2445_v15  ;;  %937 = vmatpush.bf16.msra.mxu1 %v2445_v15  ;;  %v2479_v15 = vld [vmem:[#allocation5 + $0x150] sm:$0xff] }
  0x34   :  { %909 = vmatmul.bf16.vlgmr.msra.gmra.mxu2 %v1952_v25  ;;  %889 = vmatmul.bf16.vlgmr.msra.gmra.mxu0 %v1840_v27  ;;  %v1923_v25 = vld [vmem:[#allocation2 + $0xa8] sm:$0xf]  ;;  %v2402_v27 = vld [vmem:[#allocation2 + $0xac] sm:$0xf] }
  0x35   :  { %979 = vmatpush.bf16.msrb.mxu2 %v2460_v20  ;;  %958 = vmatmul.bf16.vlgmr.msra.gmra.mxu3 %v1956_v26  ;;  %v2477_v20 = vld [vmem:[#allocation5 + $0x140] sm:$0xff] }
  0x36   :  { %938 = vmatmul.bf16.vlgmr.msra.gmra.mxu1 %v1844_v29  ;;  %1028 = vmatpush.bf16.msrb.mxu3 %v2468_v30  ;;  %v2405_v26 = vld [vmem:[#allocation2 + $0xc0] sm:$0xf0]  ;;  %v2036_v29 = vor.u32 %v2433_v22, %v2035_v21  ;;  %v2040_v30 = vor.u32 %v2430_v23, %v2037_v24  ;;  %v2487_v21 = vld [vmem:[#allocation5 + $0x190] sm:$0xff]  ;;  %v1959_v22 = vld [vmem:[#allocation2 + $0xe8] sm:$0xf] }
  0x37   :  { %1077 = vmatpush.bf16.msrb.mxu0 %v2476_v32  ;;  %1126 = vmatpush.bf16.msrb.mxu1 %v2484_v34  ;;  %v1847_v34 = vld [vmem:[#allocation2 + $0x8] sm:$0xf]  ;;  %v2413_v23 = vld [vmem:[#allocation2 + $0x100] sm:$0xf0]  ;;  %v2410_v24 = vld [vmem:[#allocation2 + $0xec] sm:$0xf] }
  0x39   :  { %980 = vmatpush.bf16.msrb.mxu2 %v2459_v28  ;;  %v1925_v28 = vld [vmem:[#allocation2 + $0xc4] sm:$0xf0] }
  0x3a   :  { %1029 = vmatpush.bf16.msrb.mxu3 %v2467_v33  ;;  %v1928_v32 = vor.u32 %v2402_v27, %v1925_v28  ;;  %v2491_v33 = vld [vmem:[#allocation5 + $0x1b0] sm:$0xff]  ;;  %v2414_v28 = vld [vmem:[#allocation2 + $0x108] sm:$0xf0] }
  0x3b   :  { %1078 = vmatpush.bf16.msrb.mxu0 %v2475_v35  ;;  %1127 = vmatpush.bf16.msrb.mxu1 %v2483_v53  ;;  %v2385_v35 = vld [vmem:[#allocation2 + $0x20] sm:$0xf0]  ;;  %v2390_v53 = vld [vmem:[#allocation2 + $0x4c] sm:$0xf]  ;;  %v1967_v27 = vld [vmem:[#allocation2 + $0xf0] sm:$0xf] }
  0x3c   :  { %v1848_v42 = vor.u32 %v2385_v35, %v1847_v34  ;;  %v1968_v34 = vor.u32 %v2414_v28, %v1967_v27 }
  0x3d   :  { %981 = vmatpush.bf16.msrb.mxu2 %v2458_v31  ;;  %v1924_v31 = vor.u32 %v2405_v26, %v1923_v25  ;;  %v1961_v25 = vld [vmem:[#allocation2 + $0x104] sm:$0xf0]  ;;  %v2785_v26 = vld [vmem:[#allocation8] sm:$0xf] }
  0x3e   :  { %1030 = vmatpush.bf16.msrb.mxu3 %v2466_v37  ;;  %v1849_v37 = vld [vmem:[#allocation2 + $0x24] sm:$0xf0] }
  0x3f   :  { %1079 = vmatpush.bf16.msrb.mxu0 %v2474_v55  ;;  %1128 = vmatpush.bf16.msrb.mxu1 %v2482_v56 }
  0x41   :  { %982 = vmatpush.bf16.msrb.mxu2 %v2457_v36  ;;  %v2382_v36 = vld [vmem:[#allocation2 + $0xc] sm:$0xf] }
  0x42   :  { %1031 = vmatpush.bf16.msrb.mxu3 %v2465_v47  ;;  %v1852_v43 = vor.u32 %v2382_v36, %v1849_v37  ;;  %v1875_v47 = vld [vmem:[#allocation2 + $0x40] sm:$0xf] }
  0x43   :  { %1080 = vmatpush.bf16.msrb.mxu0 %v2473_v59  ;;  %1129 = vmatpush.bf16.msrb.mxu1 %v2481_v60  ;;  %v2489_v59 = vld [vmem:[#allocation5 + $0x1a0] sm:$0xff]  ;;  %v1903_v60 = vld [vmem:[#allocation2 + $0x78] sm:$0xf] }
  0x44   :  { %914 = vmatmul.bf16.gmra.mxu2 %v1980_v48  ;;  %894 = vmatmul.bf16.gmra.mxu0 %v1868_v50  ;;  %v2392_v48 = vld [vmem:[#allocation2 + $0x58] sm:$0xf0]  ;;  %v1877_v50 = vld [vmem:[#allocation2 + $0x5c] sm:$0xf0] }
  0x45   :  { %983 = vmatpush.bf16.msrb.mxu2 %v2456_v44  ;;  %963 = vmatmul.bf16.gmra.mxu3 %v1984_v49  ;;  %v1856_v44 = vor.u32 %v2386_v39, %v1855_v38  ;;  %v2389_v49 = vld [vmem:[#allocation2 + $0x44] sm:$0xf]  ;;  %v1876_v55 = vor.u32 %v2392_v48, %v1875_v47  ;;  %v2486_v39 = vld [vmem:[#allocation5 + $0x188] sm:$0xff]  ;;  %v1987_v47 = vld [vmem:[#allocation2 + $0x120] sm:$0xf] }
  0x46   :  { %943 = vmatmul.bf16.gmra.mxu1 %v1872_v51  ;;  %1032 = vmatpush.bf16.msrb.mxu3 %v2464_v54  ;;  %v1883_v51 = vld [vmem:[#allocation2 + $0x48] sm:$0xf]  ;;  %v1880_v56 = vor.u32 %v2389_v49, %v1877_v50  ;;  %v2420_v48 = vld [vmem:[#allocation2 + $0x138] sm:$0xf0]  ;;  %v2417_v49 = vld [vmem:[#allocation2 + $0x124] sm:$0xf] }
  0x47   :  { %1081 = vmatpush.bf16.msrb.mxu0 %v2472_v63  ;;  %1130 = vmatpush.bf16.msrb.mxu1 %v2480_v4  ;;  %v1885_v54 = vld [vmem:[#allocation2 + $0x64] sm:$0xf0]  ;;  %v1905_v63 = vld [vmem:[#allocation2 + $0x94] sm:$0xf0]  ;;  %v1989_v50 = vld [vmem:[#allocation2 + $0x13c] sm:$0xf0] }
  0x49   :  { %984 = vmatpush.bf16.msrb.mxu2 %v2455_v52  ;;  %v2393_v52 = vld [vmem:[#allocation2 + $0x60] sm:$0xf0] }
  0x4a   :  { %1033 = vmatpush.bf16.msrb.mxu3 %v2463_v58  ;;  %v1888_v58 = vor.u32 %v2390_v53, %v1885_v54 }
  0x4b   :  { %1082 = vmatpush.bf16.msrb.mxu0 %v2471_v10  ;;  %1131 = vmatpush.bf16.msrb.mxu1 %v2479_v15  ;;  %v2406_v10 = vld [vmem:[#allocation2 + $0xc8] sm:$0xf0]  ;;  %v2404_v15 = vld [vmem:[#allocation2 + $0xbc] sm:$0xf] }
  0x4d   :  { %985 = vmatpush.bf16.msrb.mxu2 %v2454_v57  ;;  %v1884_v57 = vor.u32 %v2393_v52, %v1883_v51  ;;  %v1995_v51 = vld [vmem:[#allocation2 + $0x128] sm:$0xf]  ;;  %v2421_v52 = vld [vmem:[#allocation2 + $0x140] sm:$0xf0] }
  0x4e   :  { %1034 = vmatpush.bf16.msrb.mxu3 %v2462_v62  ;;  %v2396_v62 = vld [vmem:[#allocation2 + $0x7c] sm:$0xf] }
  0x4f   :  { %1083 = vmatpush.bf16.msrb.mxu0 %v2470_v17  ;;  %1132 = vmatpush.bf16.msrb.mxu1 %v2478_v18  ;;  %v1908_v5 = vor.u32 %v2396_v62, %v1905_v63 }
  0x51   :  { %986 = vmatpush.bf16.msrb.mxu2 %v2453_v61  ;;  %v2399_v61 = vld [vmem:[#allocation2 + $0x90] sm:$0xf0] }
  0x52   :  { %1035 = vmatpush.bf16.msrb.mxu3 %v2461_v9  ;;  %v1904_v4 = vor.u32 %v2399_v61, %v1903_v60  ;;  %v1931_v9 = vld [vmem:[#allocation2 + $0xb0] sm:$0xf]  ;;  %v1996_v60 = vor.u32 %v2421_v52, %v1995_v51 }
  0x53   :  { %1084 = vmatpush.bf16.msrb.mxu0 %v2469_v19  ;;  %1133 = vmatpush.bf16.msrb.mxu1 %v2477_v20  ;;  %v1932_v17 = vor.u32 %v2406_v10, %v1931_v9  ;;  %v2015_v9 = vld [vmem:[#allocation2 + $0x158] sm:$0xf]  ;;  %v2427_v10 = vld [vmem:[#allocation2 + $0x170] sm:$0xf0] }
  0x54   :  { %919 = vmatmul.bf16.gmra.mxu2 %v2008_v11  ;;  %899 = vmatmul.bf16.gmra.mxu0 %v1896_v13  ;;  %v2403_v11 = vld [vmem:[#allocation2 + $0xb4] sm:$0xf]  ;;  %v1939_v13 = vld [vmem:[#allocation2 + $0xb8] sm:$0xf] }
  0x55   :  { %968 = vmatmul.bf16.gmra.mxu3 %v2012_v12  ;;  %1175 = vmatpush.bf16.msra.mxu2 %v2492_v16  ;;  %v1933_v12 = vld [vmem:[#allocation2 + $0xcc] sm:$0xf0]  ;;  %v1941_v16 = vld [vmem:[#allocation2 + $0xd4] sm:$0xf0] }
  0x56   :  { %948 = vmatmul.bf16.gmra.mxu1 %v1900_v14  ;;  %v2407_v14 = vld [vmem:[#allocation2 + $0xd0] sm:$0xf0]  ;;  %v1936_v18 = vor.u32 %v2403_v11, %v1933_v12  ;;  %v1944_v20 = vor.u32 %v2404_v15, %v1941_v16  ;;  %v2424_v11 = vld [vmem:[#allocation2 + $0x15c] sm:$0xf]  ;;  %v2017_v12 = vld [vmem:[#allocation2 + $0x174] sm:$0xf0] }
  0x57   :  { %v1940_v19 = vor.u32 %v2407_v14, %v1939_v13  ;;  %v2023_v13 = vld [vmem:[#allocation2 + $0x160] sm:$0xf]  ;;  %v2428_v14 = vld [vmem:[#allocation2 + $0x178] sm:$0xf0] }
  0x59   :  { %1176 = vmatpush.bf16.msra.mxu2 %v2491_v33  ;;  %v2788_v33 = vperm.slane %v2785_v26, 0 }
  0x5d   :  { %1177 = vmatpush.bf16.msra.mxu2 %v2490_v46 }
  0x61   :  { %1178 = vmatpush.bf16.msra.mxu2 %v2489_v59  ;;  %v1992_v59 = vor.u32 %v2417_v49, %v1989_v50  ;;  %v2053_v49 = vld [vmem:[#allocation2 + $0x1b4] sm:$0xf0] }
  0x64   :  { %924 = vmatmul.bf16.gmra.mxu2 %v2036_v29  ;;  %904 = vmatmul.bf16.gmra.mxu0 %v1924_v31  ;;  %v2411_v29 = vld [vmem:[#allocation2 + $0xf4] sm:$0xf]  ;;  %v1960_v31 = vor.u32 %v2413_v23, %v1959_v22  ;;  %v2024_v22 = vor.u32 %v2428_v14, %v2023_v13  ;;  %v1891_v14 = vld [vmem:[#allocation2 + $0x50] sm:$0xf] }
  0x65   :  { %973 = vmatmul.bf16.gmra.mxu3 %v2040_v30  ;;  %1179 = vmatpush.bf16.msra.mxu2 %v2488_v8  ;;  %v1969_v30 = vld [vmem:[#allocation2 + $0x10c] sm:$0xf0] }
  0x66   :  { %953 = vmatmul.bf16.gmra.mxu1 %v1928_v32  ;;  %v1964_v32 = vor.u32 %v2410_v24, %v1961_v25  ;;  %v1972_v36 = vor.u32 %v2411_v29, %v1969_v30 }
  0x69   :  { %1180 = vmatpush.bf16.msra.mxu2 %v2487_v21  ;;  %v2020_v21 = vor.u32 %v2424_v11, %v2017_v12  ;;  %v2499_v11 = vld [vmem:[#allocation7 + $0x30] sm:$0xff] }
  0x6d   :  { %1181 = vmatpush.bf16.msra.mxu2 %v2486_v39  ;;  %v2045_v39 = vld [vmem:[#allocation2 + $0x1ac] sm:$0xf0] }
  0x71   :  { %1182 = vmatpush.bf16.msra.mxu2 %v2485_v1 }
  0x74   :  { %987 = vmatmul.bf16.vlgmr.msrb.gmra.mxu2 %v1848_v42  ;;  %1085 = vmatmul.bf16.vlgmr.msrb.gmra.mxu0 %v1856_v44 }
  0x75   :  { %1036 = vmatmul.bf16.vlgmr.msrb.gmra.mxu3 %v1852_v43 }
  0x76   :  { %1134 = vmatmul.bf16.vlgmr.msrb.gmra.mxu1 %v1860_v45 }
  0x84   :  { %992 = vmatmul.bf16.gmra.mxu2 %v1876_v55  ;;  %1090 = vmatmul.bf16.gmra.mxu0 %v1884_v57  ;;  %v2418_v55 = vld [vmem:[#allocation2 + $0x12c] sm:$0xf] }
  0x85   :  { %1041 = vmatmul.bf16.gmra.mxu3 %v1880_v56  ;;  %v1997_v56 = vld [vmem:[#allocation2 + $0x144] sm:$0xf0] }
  0x86   :  { %1139 = vmatmul.bf16.gmra.mxu1 %v1888_v58  ;;  %v1988_v58 = vor.u32 %v2420_v48, %v1987_v47  ;;  %v2000_v62 = vor.u32 %v2418_v55, %v1997_v56  ;;  %v2432_v48 = vld [vmem:[#allocation2 + $0x19c] sm:$0xf] }
  0x87   :  { %v2056_v56 = vor.u32 %v2432_v48, %v2053_v49 }
  0x94   :  { %997 = vmatmul.bf16.gmra.mxu2 %v1904_v4  ;;  %1095 = vmatmul.bf16.gmra.mxu0 %v1912_v6 }
  0x95   :  { %1046 = vmatmul.bf16.gmra.mxu3 %v1908_v5 }
  0x96   :  { %1144 = vmatmul.bf16.gmra.mxu1 %v1916_v7 }
  0xa4   :  { %1002 = vmatmul.bf16.gmra.mxu2 %v1932_v17  ;;  %1100 = vmatmul.bf16.gmra.mxu0 %v1940_v19  ;;  %v2425_v17 = vld [vmem:[#allocation2 + $0x164] sm:$0xf] }
  0xa5   :  { %1051 = vmatmul.bf16.gmra.mxu3 %v1936_v18  ;;  %v2025_v18 = vld [vmem:[#allocation2 + $0x17c] sm:$0xf0] }
  0xa6   :  { %1149 = vmatmul.bf16.gmra.mxu1 %v1944_v20  ;;  %v2016_v20 = vor.u32 %v2427_v10, %v2015_v9  ;;  %v2028_v24 = vor.u32 %v2425_v17, %v2025_v18 }
  0xb1   :  { %v890_v35 = vpop.f32.mrf.mxu0 }
  0xb2   :  { %v891_v37 = vadd.f32 %v890_v35, %v2788_v33 }
  0xb3   :  { %v939_v38 = vpop.f32.mrf.mxu1 }
  0xb4   :  { %1007 = vmatmul.bf16.gmra.mxu2 %v1960_v31  ;;  %v2791_v40 = vadd.f32 %v939_v38, %v891_v37  ;;  %1105 = vmatmul.bf16.gmra.mxu0 %v1968_v34  ;;  %v2434_v37 = vld [vmem:[#allocation2 + $0x1a8] sm:$0xf0]  ;;  %v2431_v38 = vld [vmem:[#allocation2 + $0x194] sm:$0xf] }
  0xb5   :  { %1056 = vmatmul.bf16.gmra.mxu3 %v1964_v32  ;;  %v2048_v52 = vor.u32 %v2431_v38, %v2045_v39 }
  0xb6   :  { %1154 = vmatmul.bf16.gmra.mxu1 %v1972_v36  ;;  %v2043_v36 = vld [vmem:[#allocation2 + $0x190] sm:$0xf] }
  0xb7   :  { %v910_v41 = vpop.f32.mrf.mxu2  ;;  %v2044_v51 = vor.u32 %v2434_v37, %v2043_v36  ;;  %v2408_v36 = vld [vmem:[#allocation2 + $0xd8] sm:$0xf0] }
  0xb8   :  { %v959_v42 = vpop.f32.mrf.mxu3  ;;  %v911_v43 = vadd.f32 %v910_v41, %v2788_v33  ;;  %v2051_v41 = vld [vmem:[#allocation2 + $0x198] sm:$0xf] }
  0xb9   :  { %v2796_v45 = vpop.f32.mrf.mxu0 }
  0xba   :  { %v2794_v44 = vadd.f32 %v959_v42, %v911_v43  ;;  %v2435_v42 = vld [vmem:[#allocation2 + $0x1b0] sm:$0xf0] }
  0xbb   :  { %v2798_v46 = vpop.f32.mrf.mxu1 }
  0xbf   :  { %v912_v53 = vpop.f32.mrf.mxu2 }
  0xc0   :  { %v2800_v54 = vpop.f32.mrf.mxu3  ;;  %v2803_v57 = vadd.f32 %v912_v53, %v2788_v33  ;;  %v2052_v53 = vor.u32 %v2435_v42, %v2051_v41  ;;  %v1975_v42 = vld [vmem:[#allocation2 + $0xf8] sm:$0xf] }
  0xc1   :  { %v895_v61 = vpop.f32.mrf.mxu0 }
  0xc2   :  { %v896_v63 = vadd.f32 %v895_v61, %v2788_v33  ;;  %v2500_v61 = vld [vmem:[#allocation7 + $0x38] sm:$0xff] }
  0xc3   :  { %v944_v0 = vpop.f32.mrf.mxu1  ;;  %1313 = vmatpush.bf16.msra.mxu3 %v2500_v61 }
  0xc4   :  { %1012 = vmatmul.bf16.gmra.mxu2 %v1988_v58  ;;  %v2806_v2 = vadd.f32 %v944_v0, %v896_v63  ;;  %1110 = vmatmul.bf16.gmra.mxu0 %v1996_v60 }
  0xc5   :  { %1061 = vmatmul.bf16.gmra.mxu3 %v1992_v59 }
  0xc6   :  { %1159 = vmatmul.bf16.gmra.mxu1 %v2000_v62 }
  0xc7   :  { %v915_v3 = vpop.f32.mrf.mxu2  ;;  %1314 = vmatpush.bf16.msra.mxu3 %v2499_v11 }
  0xc8   :  { %v964_v4 = vpop.f32.mrf.mxu3  ;;  %v916_v5 = vadd.f32 %v915_v3, %v2788_v33  ;;  %v1863_v3 = vld [vmem:[#allocation2 + $0x18] sm:$0xf] }
  0xc9   :  { %v2811_v7 = vpop.f32.mrf.mxu0 }
  0xca   :  { %v2809_v6 = vadd.f32 %v964_v4, %v916_v5  ;;  %v2387_v4 = vld [vmem:[#allocation2 + $0x30] sm:$0xf0] }
  0xcb   :  { %v2813_v8 = vpop.f32.mrf.mxu1  ;;  %v1864_v10 = vor.u32 %v2387_v4, %v1863_v3 }
  0xcf   :  { %v917_v15 = vpop.f32.mrf.mxu2 }
  0xd0   :  { %v2815_v16 = vpop.f32.mrf.mxu3  ;;  %v2818_v19 = vadd.f32 %v917_v15, %v2788_v33  ;;  %v2394_v15 = vld [vmem:[#allocation2 + $0x68] sm:$0xf0] }
  0xd1   :  { %v900_v23 = vpop.f32.mrf.mxu0  ;;  %v1892_v18 = vor.u32 %v2394_v15, %v1891_v14 }
  0xd2   :  { %v901_v25 = vadd.f32 %v900_v23, %v2788_v33  ;;  %v1919_v23 = vld [vmem:[#allocation2 + $0x88] sm:$0xf] }
  0xd3   :  { %v949_v27 = vpop.f32.mrf.mxu1 }
  0xd4   :  { %1017 = vmatmul.bf16.gmra.mxu2 %v2016_v20  ;;  %v2821_v28 = vadd.f32 %v949_v27, %v901_v25  ;;  %1115 = vmatmul.bf16.gmra.mxu0 %v2024_v22  ;;  %v2498_v20 = vld [vmem:[#allocation7 + $0x28] sm:$0xff] }
  0xd5   :  { %1066 = vmatmul.bf16.gmra.mxu3 %v2020_v21 }
  0xd6   :  { %1164 = vmatmul.bf16.gmra.mxu1 %v2028_v24  ;;  %1315 = vmatpush.bf16.msra.mxu3 %v2498_v20  ;;  %v2401_v24 = vld [vmem:[#allocation2 + $0xa0] sm:$0xf0] }
  0xd7   :  { %v920_v29 = vpop.f32.mrf.mxu2  ;;  %v1920_v27 = vor.u32 %v2401_v24, %v1919_v23  ;;  %v2059_v24 = vld [vmem:[#allocation2 + $0x1a0] sm:$0xf] }
  0xd8   :  { %v969_v30 = vpop.f32.mrf.mxu3  ;;  %v921_v31 = vadd.f32 %v920_v29, %v2788_v33 }
  0xd9   :  { %v2826_v34 = vpop.f32.mrf.mxu0 }
  0xda   :  { %v2824_v32 = vadd.f32 %v969_v30, %v921_v31  ;;  %v1947_v31 = vld [vmem:[#allocation2 + $0xc0] sm:$0xf] }
  0xdb   :  { %v2828_v35 = vpop.f32.mrf.mxu1  ;;  %v1948_v38 = vor.u32 %v2408_v36, %v1947_v31 }
  0xdf   :  { %v922_v43 = vpop.f32.mrf.mxu2 }
  0xe0   :  { %v2830_v47 = vpop.f32.mrf.mxu3  ;;  %v2833_v50 = vadd.f32 %v922_v43, %v2788_v33  ;;  %v2415_v43 = vld [vmem:[#allocation2 + $0x110] sm:$0xf0] }
  0xe1   :  { %v905_v55 = vpop.f32.mrf.mxu0  ;;  %v1976_v49 = vor.u32 %v2415_v43, %v1975_v42  ;;  %v893_v42 = vadd.f32 %v2796_v45, %v2788_v33  ;;  %v898_v45 = vadd.f32 %v2811_v7, %v2788_v33 }
  0xe2   :  { %v906_v58 = vadd.f32 %v905_v55, %v2788_v33  ;;  %v2422_v55 = vld [vmem:[#allocation2 + $0x148] sm:$0xf0] }
  0xe3   :  { %v954_v59 = vpop.f32.mrf.mxu1 }
  0xe4   :  { %1022 = vmatmul.bf16.gmra.mxu2 %v2044_v51  ;;  %v955_v60 = vadd.f32 %v954_v59, %v906_v58  ;;  %1120 = vmatmul.bf16.gmra.mxu0 %v2052_v53  ;;  %v2003_v53 = vld [vmem:[#allocation2 + $0x130] sm:$0xf] }
  0xe5   :  { %1071 = vmatmul.bf16.gmra.mxu3 %v2048_v52 }
  0xe6   :  { %1169 = vmatmul.bf16.gmra.mxu1 %v2056_v56  ;;  %v962_v56 = vadd.f32 %v2800_v54, %v2803_v57  ;;  %v967_v54 = vadd.f32 %v2815_v16, %v2818_v19  ;;  %v972_v16 = vadd.f32 %v2830_v47, %v2833_v50 }
  0xe7   :  { %v925_v62 = vpop.f32.mrf.mxu2 }
  0xe8   :  { %v974_v63 = vpop.f32.mrf.mxu3  ;;  %v926_v0 = vadd.f32 %v925_v62, %v2788_v33  ;;  %v2494_v62 = vld [vmem:[#allocation7 + $0x8] sm:$0xff] }
  0xea   :  { %v2837_v1 = vadd.f32 %v974_v63, %v926_v0  ;;  %v2868_v63 = vpop.f32.mrf.mxu0 }
  0xef   :  { %v927_v5 = vpop.f32.mrf.mxu2 }
  0xf0   :  { %v2840_v9 = vadd.f32 %v927_v5, %v2788_v33  ;;  %v976_v61 = vpop.f32.mrf.mxu3  ;;  %v2031_v5 = vld [vmem:[#allocation2 + $0x168] sm:$0xf] }
  0xf2   :  { %v1086_v14 = vpop.f32.mrf.mxu0  ;;  %v977_v47 = vadd.f32 %v976_v61, %v2840_v9 }
  0xf4   :  { %1183 = vmatmul.bf16.vlgmr.msra.gmra.mxu2 %v1864_v10  ;;  %v2429_v10 = vld [vmem:[#allocation2 + $0x180] sm:$0xf0] }
  0xf7   :  { %v988_v12 = vpop.f32.mrf.mxu2 }
  0xf8   :  { %v2843_v13 = vadd.f32 %v988_v12, %v2791_v40  ;;  %v2497_v40 = vld [vmem:[#allocation7 + $0x20] sm:$0xff]  ;;  %v1037_v4 = vpop.f32.mrf.mxu3  ;;  %v2032_v12 = vor.u32 %v2429_v10, %v2031_v5  ;;  %v2508_v5 = vld [vmem:[#allocation7 + $0x78] sm:$0xff]  ;;  %v947_v10 = vadd.f32 %v2813_v8, %v898_v45  ;;  %v903_v8 = vadd.f32 %v2826_v34, %v2788_v33 }
  0xf9   :  { %1316 = vmatpush.bf16.msra.mxu3 %v2497_v40  ;;  %1452 = vmatpush.bf16.msra.mxu0 %v2508_v5 }
  0xfa   :  { %v1088_v23 = vpop.f32.mrf.mxu0 }
  0xff   :  { %v2845_v17 = vpop.f32.mrf.mxu2 }
 0x100   :  { %v1039_v20 = vpop.f32.mrf.mxu3 }
 0x104   :  { %1188 = vmatmul.bf16.gmra.mxu2 %v1892_v18  ;;  %v2493_v18 = vld [vmem:[#allocation7] sm:$0xff] }
 0x107   :  { %v993_v21 = vpop.f32.mrf.mxu2 }
 0x108   :  { %v2848_v22 = vadd.f32 %v993_v21, %v2806_v2  ;;  %v2496_v2 = vld [vmem:[#allocation7 + $0x18] sm:$0xff]  ;;  %v1042_v36 = vpop.f32.mrf.mxu3 }
 0x109   :  { %1317 = vmatpush.bf16.msra.mxu3 %v2496_v2 }
 0x10f   :  { %v2850_v25 = vpop.f32.mrf.mxu2 }
 0x110   :  { %v1044_v43 = vpop.f32.mrf.mxu3 }
 0x114   :  { %1193 = vmatmul.bf16.gmra.mxu2 %v1920_v27  ;;  %v2436_v27 = vld [vmem:[#allocation2 + $0x1b8] sm:$0xf0] }
 0x115   :  { %v2060_v31 = vor.u32 %v2436_v27, %v2059_v24 }
 0x117   :  { %v998_v29 = vpop.f32.mrf.mxu2 }
 0x118   :  { %v2853_v30 = vadd.f32 %v998_v29, %v2821_v28  ;;  %v2495_v28 = vld [vmem:[#allocation7 + $0x10] sm:$0xff] }
 0x119   :  { %1318 = vmatpush.bf16.msra.mxu3 %v2495_v28 }
 0x11d   :  { %1319 = vmatpush.bf16.msra.mxu3 %v2494_v62 }
 0x11f   :  { %v2855_v37 = vpop.f32.mrf.mxu2 }
 0x121   :  { %1320 = vmatpush.bf16.msra.mxu3 %v2493_v18 }
 0x124   :  { %1198 = vmatmul.bf16.gmra.mxu2 %v1948_v38  ;;  %v1091_v38 = vpop.f32.mrf.mxu0 }
 0x127   :  { %v1003_v39 = vpop.f32.mrf.mxu2 }
 0x128   :  { %v2857_v41 = vadd.f32 %v1003_v39, %v955_v60  ;;  %v2004_v60 = vor.u32 %v2422_v55, %v2003_v53 }
 0x12c   :  { %v1093_v50 = vpop.f32.mrf.mxu0 }
 0x12f   :  { %v2859_v48 = vpop.f32.mrf.mxu2 }
 0x134   :  { %1203 = vmatmul.bf16.gmra.mxu2 %v1976_v49  ;;  %v942_v49 = vadd.f32 %v2798_v46, %v893_v42 }
 0x136   :  { %v991_v53 = vadd.f32 %v2845_v17, %v942_v49 }
 0x137   :  { %v1008_v51 = vpop.f32.mrf.mxu2 }
 0x138   :  { %v2862_v52 = vadd.f32 %v1008_v51, %v2794_v44  ;;  %v2873_v44 = vpop.f32.mrf.mxu1 }
 0x13f   :  { %v1010_v58 = vpop.f32.mrf.mxu2 }
 0x140   :  { %v2866_v59 = vadd.f32 %v1010_v58, %v962_v56  ;;  %v1135_v15 = vpop.f32.mrf.mxu1  ;;  %v1038_v56 = vadd.f32 %v1037_v4, %v2843_v13  ;;  %v1040_v58 = vadd.f32 %v1039_v20, %v991_v53  ;;  %v996_v4 = vadd.f32 %v2850_v25, %v947_v10 }
 0x142   :  { %v1087_v62 = vadd.f32 %v1086_v14, %v1038_v56  ;;  %v1089_v46 = vadd.f32 %v1088_v23, %v1040_v58  ;;  %v1045_v23 = vadd.f32 %v1044_v43, %v996_v4 }
 0x144   :  { %1208 = vmatmul.bf16.gmra.mxu2 %v2004_v60  ;;  %v1136_v9 = vadd.f32 %v1135_v15, %v1087_v62  ;;  %v2506_v62 = vld [vmem:[#allocation7 + $0x68] sm:$0xff] }
 0x147   :  { %v1013_v0 = vpop.f32.mrf.mxu2 }
 0x148   :  { %v2871_v3 = vadd.f32 %v1013_v0, %v2809_v6  ;;  %v1137_v19 = vpop.f32.mrf.mxu1  ;;  %v1096_v0 = vpop.f32.mrf.mxu0 }
 0x14f   :  { %v1015_v57 = vpop.f32.mrf.mxu2 }
 0x150   :  { %v2877_v11 = vadd.f32 %v1015_v57, %v967_v54  ;;  %v1138_v54 = vadd.f32 %v1137_v19, %v1089_v46  ;;  %v1098_v20 = vpop.f32.mrf.mxu0  ;;  %v1094_v19 = vadd.f32 %v1093_v50, %v1045_v23 }
 0x154   :  { %1213 = vmatmul.bf16.gmra.mxu2 %v2032_v12 }
 0x157   :  { %v1018_v6 = vpop.f32.mrf.mxu2 }
 0x158   :  { %v2880_v21 = vadd.f32 %v1018_v6, %v2824_v32  ;;  %v1140_v32 = vpop.f32.mrf.mxu1  ;;  %v1043_v6 = vadd.f32 %v1042_v36, %v2848_v22  ;;  %v1101_v25 = vpop.f32.mrf.mxu0 }
 0x15a   :  { %v1092_v27 = vadd.f32 %v1091_v38, %v1043_v6 }
 0x15f   :  { %v1020_v40 = vpop.f32.mrf.mxu2 }
 0x160   :  { %v2884_v29 = vadd.f32 %v1020_v40, %v972_v16  ;;  %v1142_v55 = vpop.f32.mrf.mxu1  ;;  %v2507_v40 = vld [vmem:[#allocation7 + $0x70] sm:$0xff] }
 0x161   :  { %1453 = vmatpush.bf16.msra.mxu0 %v2507_v40  ;;  %v1143_v42 = vadd.f32 %v1142_v55, %v1094_v19 }
 0x164   :  { %1218 = vmatmul.bf16.gmra.mxu2 %v2060_v31  ;;  %v1141_v31 = vadd.f32 %v1140_v32, %v1092_v27  ;;  %v1103_v32 = vpop.f32.mrf.mxu0 }
 0x165   :  { %1454 = vmatpush.bf16.msra.mxu0 %v2506_v62 }
 0x167   :  { %v1023_v2 = vpop.f32.mrf.mxu2 }
 0x168   :  { %v2887_v39 = vadd.f32 %v1023_v2, %v2837_v1  ;;  %v1047_v1 = vpop.f32.mrf.mxu3  ;;  %v1145_v61 = vpop.f32.mrf.mxu1  ;;  %v952_v2 = vadd.f32 %v2828_v35, %v903_v8  ;;  %v908_v35 = vadd.f32 %v2868_v63, %v2788_v33 }
 0x169   :  { %v1048_v56 = vadd.f32 %v1047_v1, %v2853_v30 }
 0x16a   :  { %v957_v5 = vadd.f32 %v2873_v44, %v908_v35  ;;  %v2505_v44 = vld [vmem:[#allocation7 + $0x60] sm:$0xff] }
 0x16b   :  { %1455 = vmatpush.bf16.msra.mxu0 %v2505_v44 }
 0x16f   :  { %v1025_v28 = vpop.f32.mrf.mxu2 }
 0x170   :  { %v2893_v51 = vadd.f32 %v1025_v28, %v977_v47  ;;  %v1049_v57 = vpop.f32.mrf.mxu3  ;;  %v1147_v15 = vpop.f32.mrf.mxu1  ;;  %v1001_v47 = vadd.f32 %v2855_v37, %v952_v2 }
 0x172   :  { %v1050_v50 = vadd.f32 %v1049_v57, %v1001_v47 }
 0x174   :  { %v1099_v55 = vadd.f32 %v1098_v20, %v1050_v50 }
 0x177   :  { %v1184_v60 = vpop.f32.mrf.mxu2 }
 0x178   :  { %v1185_v17 = vadd.f32 %v1184_v60, %v1136_v9  ;;  %v1052_v16 = vpop.f32.mrf.mxu3  ;;  %v1150_v43 = vpop.f32.mrf.mxu1  ;;  %v1097_v60 = vadd.f32 %v1096_v0, %v1048_v56  ;;  %v1148_v9 = vadd.f32 %v1147_v15, %v1099_v55 }
 0x17a   :  { %v1224_v18 = vmax.f32 %v1185_v17, 0.0  ;;  %v1146_v46 = vadd.f32 %v1145_v61, %v1097_v60  ;;  %v1006_v17 = vadd.f32 %v2859_v48, %v957_v5 }
 0x17f   :  { %v1186_v12 = vpop.f32.mrf.mxu2 }
 0x180   :  { %v1187_v13 = vadd.f32 %v1186_v12, %v1138_v54  ;;  %v1054_v53 = vpop.f32.mrf.mxu3  ;;  %v1152_v45 = vpop.f32.mrf.mxu1  ;;  %v1053_v12 = vadd.f32 %v1052_v16, %v2857_v41 }
 0x181   :  { %v1106_v54 = vpop.f32.mrf.mxu0 }
 0x182   :  { %v1225_v14 = vmax.f32 %v1187_v13, 0.0  ;;  %v1055_v13 = vadd.f32 %v1054_v53, %v1006_v17 }
 0x184   :  { %v1240_v7 = vpack.c.bf16 %v1225_v14, %v1224_v18  ;;  %v1102_v18 = vadd.f32 %v1101_v25, %v1053_v12  ;;  %v1104_v14 = vadd.f32 %v1103_v32, %v1055_v13 }
 0x186   :  { %1321 = vmatmul.bf16.vlgmr.msra.gmra.mxu3 %v1240_v7  ;;  %v1151_v6 = vadd.f32 %v1150_v43, %v1102_v18  ;;  %v1153_v7 = vadd.f32 %v1152_v45, %v1104_v14 }
 0x187   :  { %v1189_v24 = vpop.f32.mrf.mxu2 }
 0x188   :  { %v1190_v49 = vadd.f32 %v1189_v24, %v1141_v31  ;;  %v1057_v37 = vpop.f32.mrf.mxu3  ;;  %v1155_v63 = vpop.f32.mrf.mxu1 }
 0x189   :  { %v1108_v20 = vpop.f32.mrf.mxu0  ;;  %v1058_v16 = vadd.f32 %v1057_v37, %v2862_v52 }
 0x18a   :  { %v1226_v28 = vmax.f32 %v1190_v49, 0.0 }
 0x18b   :  { %v1107_v2 = vadd.f32 %v1106_v54, %v1058_v16 }
 0x18d   :  { %v1156_v43 = vadd.f32 %v1155_v63, %v1107_v2 }
 0x18f   :  { %v1191_v22 = vpop.f32.mrf.mxu2 }
 0x190   :  { %v1192_v36 = vadd.f32 %v1191_v22, %v1143_v42  ;;  %v1059_v61 = vpop.f32.mrf.mxu3  ;;  %v1157_v15 = vpop.f32.mrf.mxu1  ;;  %v2504_v22 = vld [vmem:[#allocation7 + $0x58] sm:$0xff] }
 0x191   :  { %v1111_v40 = vpop.f32.mrf.mxu0  ;;  %v1060_v31 = vadd.f32 %v1059_v61, %v2866_v59  ;;  %1456 = vmatpush.bf16.msra.mxu0 %v2504_v22 }
 0x192   :  { %v1227_v38 = vmax.f32 %v1192_v36, 0.0 }
 0x193   :  { %v1109_v49 = vadd.f32 %v1108_v20, %v1060_v31 }
 0x194   :  { %v1241_v34 = vpack.c.bf16 %v1227_v38, %v1226_v28 }
 0x195   :  { %v1158_v47 = vadd.f32 %v1157_v15, %v1109_v49 }
 0x196   :  { %1326 = vmatmul.bf16.gmra.mxu3 %v1241_v34 }
 0x197   :  { %v1194_v58 = vpop.f32.mrf.mxu2 }
 0x198   :  { %v1195_v10 = vadd.f32 %v1194_v58, %v1146_v46  ;;  %v1062_v27 = vpop.f32.mrf.mxu3  ;;  %v1160_v42 = vpop.f32.mrf.mxu1  ;;  %v2503_v46 = vld [vmem:[#allocation7 + $0x50] sm:$0xff] }
 0x199   :  { %v1113_v38 = vpop.f32.mrf.mxu0  ;;  %v1063_v32 = vadd.f32 %v1062_v27, %v2871_v3  ;;  %1457 = vmatpush.bf16.msra.mxu0 %v2503_v46 }
 0x19a   :  { %v1228_v57 = vmax.f32 %v1195_v10, 0.0 }
 0x19b   :  { %v1112_v55 = vadd.f32 %v1111_v40, %v1063_v32 }
 0x19d   :  { %v1161_v37 = vadd.f32 %v1160_v42, %v1112_v55 }
 0x19f   :  { %v1196_v30 = vpop.f32.mrf.mxu2 }
 0x1a0   :  { %v1197_v1 = vadd.f32 %v1196_v30, %v1148_v9  ;;  %v1064_v36 = vpop.f32.mrf.mxu3  ;;  %v1162_v50 = vpop.f32.mrf.mxu1 }
 0x1a1   :  { %v1065_v60 = vadd.f32 %v1064_v36, %v2877_v11  ;;  %v1116_v62 = vpop.f32.mrf.mxu0 }
 0x1a2   :  { %v1229_v0 = vmax.f32 %v1197_v1, 0.0 }
 0x1a3   :  { %v1114_v45 = vadd.f32 %v1113_v38, %v1065_v60  ;;  %v2516_v38 = vld [vmem:[#allocation7 + $0xb8] sm:$0xff] }
 0x1a4   :  { %v1242_v33 = vpack.c.bf16 %v1229_v0, %v1228_v57  ;;  %1591 = vmatpush.bf16.msra.mxu1 %v2516_v38 }
 0x1a5   :  { %v1163_v9 = vadd.f32 %v1162_v50, %v1114_v45 }
 0x1a6   :  { %1331 = vmatmul.bf16.gmra.mxu3 %v1242_v33  ;;  %v2502_v33 = vld [vmem:[#allocation7 + $0x48] sm:$0xff] }
 0x1a7   :  { %v1199_v4 = vpop.f32.mrf.mxu2  ;;  %1458 = vmatpush.bf16.msra.mxu0 %v2502_v33 }
 0x1a8   :  { %v1200_v23 = vadd.f32 %v1199_v4, %v1151_v6  ;;  %v1067_v58 = vpop.f32.mrf.mxu3  ;;  %v1165_v5 = vpop.f32.mrf.mxu1  ;;  %v2501_v4 = vld [vmem:[#allocation7 + $0x40] sm:$0xff] }
 0x1a9   :  { %v1118_v57 = vpop.f32.mrf.mxu0  ;;  %v1068_v0 = vadd.f32 %v1067_v58, %v2880_v21 }
 0x1aa   :  { %v1230_v8 = vmax.f32 %v1200_v23, 0.0 }
 0x1ab   :  { %v1117_v61 = vadd.f32 %v1116_v62, %v1068_v0  ;;  %1459 = vmatpush.bf16.msra.mxu0 %v2501_v4 }
 0x1ad   :  { %v1166_v44 = vadd.f32 %v1165_v5, %v1117_v61  ;;  %v2512_v61 = vld [vmem:[#allocation7 + $0x98] sm:$0xff] }
 0x1af   :  { %v1201_v48 = vpop.f32.mrf.mxu2 }
 0x1b0   :  { %v1202_v24 = vadd.f32 %v1201_v48, %v1153_v7  ;;  %v1069_v30 = vpop.f32.mrf.mxu3  ;;  %v1167_v63 = vpop.f32.mrf.mxu1 }
 0x1b1   :  { %v1070_v12 = vadd.f32 %v1069_v30, %v2884_v29  ;;  %v1121_v20 = vpop.f32.mrf.mxu0 }
 0x1b2   :  { %v1231_v41 = vmax.f32 %v1202_v24, 0.0 }
 0x1b3   :  { %v1119_v14 = vadd.f32 %v1118_v57, %v1070_v12 }
 0x1b4   :  { %v1243_v19 = vpack.c.bf16 %v1231_v41, %v1230_v8 }
 0x1b5   :  { %v1168_v6 = vadd.f32 %v1167_v63, %v1119_v14 }
 0x1b6   :  { %1336 = vmatmul.bf16.gmra.mxu3 %v1243_v19 }
 0x1b7   :  { %v1204_v25 = vpop.f32.mrf.mxu2 }
 0x1b8   :  { %v1205_v28 = vadd.f32 %v1204_v25, %v1156_v43  ;;  %v1072_v18 = vpop.f32.mrf.mxu3  ;;  %v1170_v21 = vpop.f32.mrf.mxu1 }
 0x1b9   :  { %v1073_v27 = vadd.f32 %v1072_v18, %v2887_v39  ;;  %v1123_v16 = vpop.f32.mrf.mxu0 }
 0x1ba   :  { %v1232_v34 = vmax.f32 %v1205_v28, 0.0 }
 0x1bb   :  { %v1122_v40 = vadd.f32 %v1121_v20, %v1073_v27 }
 0x1bd   :  { %v1171_v2 = vadd.f32 %v1170_v21, %v1122_v40 }
 0x1bf   :  { %v1206_v53 = vpop.f32.mrf.mxu2 }
 0x1c0   :  { %v1207_v56 = vadd.f32 %v1206_v53, %v1158_v47  ;;  %v1074_v29 = vpop.f32.mrf.mxu3  ;;  %v1172_v25 = vpop.f32.mrf.mxu1 }
 0x1c1   :  { %v1075_v41 = vadd.f32 %v1074_v29, %v2893_v51  ;;  %v2921_v51 = vperm.slane %v2785_v26, 1 }
 0x1c2   :  { %v1233_v52 = vmax.f32 %v1207_v56, 0.0 }
 0x1c3   :  { %v1124_v31 = vadd.f32 %v1123_v16, %v1075_v41  ;;  %v2510_v41 = vld [vmem:[#allocation7 + $0x88] sm:$0xff]  ;;  %v2509_v16 = vld [vmem:[#allocation7 + $0x80] sm:$0xff] }
 0x1c4   :  { %v1244_v59 = vpack.c.bf16 %v1233_v52, %v1232_v34 }
 0x1c5   :  { %v1173_v42 = vadd.f32 %v1172_v25, %v1124_v31 }
 0x1c6   :  { %1341 = vmatmul.bf16.gmra.mxu3 %v1244_v59  ;;  %v2515_v59 = vld [vmem:[#allocation7 + $0xb0] sm:$0xff] }
 0x1c7   :  { %v1209_v35 = vpop.f32.mrf.mxu2  ;;  %1592 = vmatpush.bf16.msra.mxu1 %v2515_v59 }
 0x1c8   :  { %v1210_v10 = vadd.f32 %v1209_v35, %v1161_v37  ;;  %v2514_v37 = vld [vmem:[#allocation7 + $0xa8] sm:$0xff] }
 0x1ca   :  { %v1234_v17 = vmax.f32 %v1210_v10, 0.0 }
 0x1cb   :  { %1593 = vmatpush.bf16.msra.mxu1 %v2514_v37 }
 0x1cf   :  { %v1211_v1 = vpop.f32.mrf.mxu2 }
 0x1d0   :  { %v1212_v54 = vadd.f32 %v1211_v1, %v1163_v9 }
 0x1d2   :  { %v1235_v3 = vmax.f32 %v1212_v54, 0.0 }
 0x1d4   :  { %v1245_v11 = vpack.c.bf16 %v1235_v3, %v1234_v17  ;;  %v2513_v3 = vld [vmem:[#allocation7 + $0xa0] sm:$0xff] }
 0x1d5   :  { %1594 = vmatpush.bf16.msra.mxu1 %v2513_v3 }
 0x1d6   :  { %1346 = vmatmul.bf16.gmra.mxu3 %v1245_v11 }
 0x1d7   :  { %v1214_v13 = vpop.f32.mrf.mxu2 }
 0x1d8   :  { %v1215_v7 = vadd.f32 %v1214_v13, %v1166_v44 }
 0x1d9   :  { %1595 = vmatpush.bf16.msra.mxu1 %v2512_v61 }
 0x1da   :  { %v1236_v48 = vmax.f32 %v1215_v7, 0.0 }
 0x1df   :  { %v1216_v23 = vpop.f32.mrf.mxu2 }
 0x1e0   :  { %v1217_v15 = vadd.f32 %v1216_v23, %v1168_v6  ;;  %v2511_v23 = vld [vmem:[#allocation7 + $0x90] sm:$0xff] }
 0x1e1   :  { %1596 = vmatpush.bf16.msra.mxu1 %v2511_v23 }
 0x1e2   :  { %v1237_v24 = vmax.f32 %v1217_v15, 0.0 }
 0x1e4   :  { %v1246_v8 = vpack.c.bf16 %v1237_v24, %v1236_v48 }
 0x1e5   :  { %1597 = vmatpush.bf16.msra.mxu1 %v2510_v41 }
 0x1e6   :  { %1351 = vmatmul.bf16.gmra.mxu3 %v1246_v8 }
 0x1e7   :  { %v1219_v19 = vpop.f32.mrf.mxu2 }
 0x1e8   :  { %v1220_v49 = vadd.f32 %v1219_v19, %v1171_v2 }
 0x1e9   :  { %1598 = vmatpush.bf16.msra.mxu1 %v2509_v16 }
 0x1ea   :  { %v1238_v43 = vmax.f32 %v1220_v49, 0.0 }
 0x1ef   :  { %v1221_v22 = vpop.f32.mrf.mxu2 }
 0x1f0   :  { %v1222_v36 = vadd.f32 %v1221_v22, %v1173_v42 }
 0x1f2   :  { %v1239_v47 = vmax.f32 %v1222_v36, 0.0 }
 0x1f4   :  { %v1247_v28 = vpack.c.bf16 %v1239_v47, %v1238_v43 }
 0x1f6   :  { %1356 = vmatmul.bf16.gmra.mxu3 %v1247_v28 }
 0x209   :  { %v1322_v39 = vpop.f32.mrf.mxu3 }
 0x20a   :  { %v1323_v53 = vadd.f32 %v1322_v39, %v2921_v51 }
 0x20c   :  { %v1362_v52 = vmax.f32 %v1323_v53, 0.0 }
 0x211   :  { %v1324_v56 = vpop.f32.mrf.mxu3 }
 0x212   :  { %v1325_v34 = vadd.f32 %v1324_v56, %v2921_v51  ;;  %v1403_v56 = vperm.slane %v2785_v26, 2 }
 0x214   :  { %v1363_v50 = vmax.f32 %v1325_v34, 0.0 }
 0x216   :  { %v1378_v32 = vpack.c.bf16 %v1363_v50, %v1362_v52 }
 0x218   :  { %1460 = vmatmul.bf16.vlgmr.msra.gmra.mxu0 %v1378_v32 }
 0x219   :  { %v1327_v58 = vpop.f32.mrf.mxu3 }
 0x21a   :  { %v1328_v60 = vadd.f32 %v1327_v58, %v2921_v51 }
 0x21c   :  { %v1364_v62 = vmax.f32 %v1328_v60, 0.0 }
 0x221   :  { %v1329_v35 = vpop.f32.mrf.mxu3 }
 0x222   :  { %v1330_v55 = vadd.f32 %v1329_v35, %v2921_v51 }
 0x224   :  { %v1365_v45 = vmax.f32 %v1330_v55, 0.0 }
 0x226   :  { %v1379_v46 = vpack.c.bf16 %v1365_v45, %v1364_v62 }
 0x228   :  { %1465 = vmatmul.bf16.gmra.mxu0 %v1379_v46 }
 0x229   :  { %v1332_v5 = vpop.f32.mrf.mxu3 }
 0x22a   :  { %v1333_v9 = vadd.f32 %v1332_v5, %v2921_v51 }
 0x22c   :  { %v1366_v1 = vmax.f32 %v1333_v9, 0.0 }
 0x231   :  { %v1334_v10 = vpop.f32.mrf.mxu3 }
 0x232   :  { %v1335_v30 = vadd.f32 %v1334_v10, %v2921_v51 }
 0x234   :  { %v1367_v54 = vmax.f32 %v1335_v30, 0.0 }
 0x236   :  { %v1380_v17 = vpack.c.bf16 %v1367_v54, %v1366_v1 }
 0x238   :  { %1470 = vmatmul.bf16.gmra.mxu0 %v1380_v17 }
 0x239   :  { %v1337_v57 = vpop.f32.mrf.mxu3 }
 0x23a   :  { %v1338_v0 = vadd.f32 %v1337_v57, %v2921_v51 }
 0x23c   :  { %v1368_v33 = vmax.f32 %v1338_v0, 0.0 }
 0x241   :  { %v1339_v11 = vpop.f32.mrf.mxu3 }
 0x242   :  { %v1340_v12 = vadd.f32 %v1339_v11, %v2921_v51 }
 0x244   :  { %v1369_v63 = vmax.f32 %v1340_v12, 0.0 }
 0x246   :  { %v1381_v13 = vpack.c.bf16 %v1369_v63, %v1368_v33 }
 0x248   :  { %1475 = vmatmul.bf16.gmra.mxu0 %v1381_v13 }
 0x249   :  { %v1342_v4 = vpop.f32.mrf.mxu3 }
 0x24a   :  { %v1343_v18 = vadd.f32 %v1342_v4, %v2921_v51 }
 0x24c   :  { %v1370_v20 = vmax.f32 %v1343_v18, 0.0 }
 0x251   :  { %v1344_v14 = vpop.f32.mrf.mxu3 }
 0x252   :  { %v1345_v44 = vadd.f32 %v1344_v14, %v2921_v51 }
 0x254   :  { %v1371_v6 = vmax.f32 %v1345_v44, 0.0 }
 0x256   :  { %v1382_v7 = vpack.c.bf16 %v1371_v6, %v1370_v20 }
 0x258   :  { %1480 = vmatmul.bf16.gmra.mxu0 %v1382_v7 }
 0x259   :  { %v1347_v15 = vpop.f32.mrf.mxu3 }
 0x25a   :  { %v1348_v21 = vadd.f32 %v1347_v15, %v2921_v51 }
 0x25c   :  { %v1372_v29 = vmax.f32 %v1348_v21, 0.0 }
 0x261   :  { %v1349_v48 = vpop.f32.mrf.mxu3 }
 0x262   :  { %v1350_v24 = vadd.f32 %v1349_v48, %v2921_v51 }
 0x264   :  { %v1373_v27 = vmax.f32 %v1350_v24, 0.0 }
 0x266   :  { %v1383_v8 = vpack.c.bf16 %v1373_v27, %v1372_v29 }
 0x268   :  { %1485 = vmatmul.bf16.gmra.mxu0 %v1383_v8 }
 0x269   :  { %v1352_v19 = vpop.f32.mrf.mxu3 }
 0x26a   :  { %v1353_v40 = vadd.f32 %v1352_v19, %v2921_v51 }
 0x26c   :  { %v1374_v2 = vmax.f32 %v1353_v40, 0.0 }
 0x271   :  { %v1354_v31 = vpop.f32.mrf.mxu3 }
 0x272   :  { %v1355_v25 = vadd.f32 %v1354_v31, %v2921_v51 }
 0x274   :  { %v1375_v42 = vmax.f32 %v1355_v25, 0.0 }
 0x276   :  { %v1384_v49 = vpack.c.bf16 %v1375_v42, %v1374_v2 }
 0x278   :  { %1490 = vmatmul.bf16.gmra.mxu0 %v1384_v49 }
 0x279   :  { %v1357_v22 = vpop.f32.mrf.mxu3 }
 0x27a   :  { %v1358_v36 = vadd.f32 %v1357_v22, %v2921_v51  ;;  %v2608_v22 = vld [vmem:[#allocation8] sm:$0xf] }
 0x27c   :  { %v1376_v28 = vmax.f32 %v1358_v36, 0.0  ;;  %v1542_v36 = vperm.slane %v2608_v22, 3 }
 0x281   :  { %v1359_v43 = vpop.f32.mrf.mxu3 }
 0x282   :  { %v1360_v47 = vadd.f32 %v1359_v43, %v2921_v51 }
 0x284   :  { %v1377_v38 = vmax.f32 %v1360_v47, 0.0 }
 0x286   :  { %v1385_v39 = vpack.c.bf16 %v1377_v38, %v1376_v28 }
 0x288   :  { %1495 = vmatmul.bf16.gmra.mxu0 %v1385_v39 }
 0x295   :  { %v1461_v53 = vpop.f32.mrf.mxu0 }
 0x296   :  { %v1462_v34 = vadd.f32 %v1461_v53, %v1403_v56 }
 0x298   :  { %v1501_v32 = vmax.f32 %v1462_v34, 0.0 }
 0x29d   :  { %v1463_v52 = vpop.f32.mrf.mxu0 }
 0x29e   :  { %v1464_v50 = vadd.f32 %v1463_v52, %v1403_v56 }
 0x2a0   :  { %v1502_v59 = vmax.f32 %v1464_v50, 0.0 }
 0x2a2   :  { %v1517_v58 = vpack.c.bf16 %v1502_v59, %v1501_v32 }
 0x2a4   :  { %1599 = vmatmul.bf16.vlgmr.msra.gmra.mxu1 %v1517_v58 }
 0x2a5   :  { %v1466_v60 = vpop.f32.mrf.mxu0 }
 0x2a6   :  { %v1467_v35 = vadd.f32 %v1466_v60, %v1403_v56 }
 0x2a8   :  { %v1503_v45 = vmax.f32 %v1467_v35, 0.0 }
 0x2ad   :  { %v1468_v55 = vpop.f32.mrf.mxu0 }
 0x2ae   :  { %v1469_v62 = vadd.f32 %v1468_v55, %v1403_v56 }
 0x2b0   :  { %v1504_v51 = vmax.f32 %v1469_v62, 0.0 }
 0x2b2   :  { %v1518_v46 = vpack.c.bf16 %v1504_v51, %v1503_v45 }
 0x2b4   :  { %1604 = vmatmul.bf16.gmra.mxu1 %v1518_v46 }
 0x2b5   :  { %v1471_v37 = vpop.f32.mrf.mxu0 }
 0x2b6   :  { %v1472_v5 = vadd.f32 %v1471_v37, %v1403_v56 }
 0x2b8   :  { %v1505_v26 = vmax.f32 %v1472_v5, 0.0 }
 0x2bd   :  { %v1473_v9 = vpop.f32.mrf.mxu0 }
 0x2be   :  { %v1474_v10 = vadd.f32 %v1473_v9, %v1403_v56 }
 0x2c0   :  { %v1506_v30 = vmax.f32 %v1474_v10, 0.0 }
 0x2c2   :  { %v1519_v1 = vpack.c.bf16 %v1506_v30, %v1505_v26 }
 0x2c4   :  { %1609 = vmatmul.bf16.gmra.mxu1 %v1519_v1 }
 0x2c5   :  { %v1476_v54 = vpop.f32.mrf.mxu0 }
 0x2c6   :  { %v1477_v17 = vadd.f32 %v1476_v54, %v1403_v56 }
 0x2c8   :  { %v1507_v0 = vmax.f32 %v1477_v17, 0.0 }
 0x2cd   :  { %v1478_v3 = vpop.f32.mrf.mxu0 }
 0x2ce   :  { %v1479_v57 = vadd.f32 %v1478_v3, %v1403_v56 }
 0x2d0   :  { %v1508_v11 = vmax.f32 %v1479_v57, 0.0 }
 0x2d2   :  { %v1520_v12 = vpack.c.bf16 %v1508_v11, %v1507_v0 }
 0x2d4   :  { %1614 = vmatmul.bf16.gmra.mxu1 %v1520_v12 }
 0x2d5   :  { %v1481_v33 = vpop.f32.mrf.mxu0 }
 0x2d6   :  { %v1482_v63 = vadd.f32 %v1481_v33, %v1403_v56 }
 0x2d8   :  { %v1509_v4 = vmax.f32 %v1482_v63, 0.0 }
 0x2dd   :  { %v1483_v13 = vpop.f32.mrf.mxu0 }
 0x2de   :  { %v1484_v61 = vadd.f32 %v1483_v13, %v1403_v56 }
 0x2e0   :  { %v1510_v18 = vmax.f32 %v1484_v61, 0.0 }
 0x2e2   :  { %v1521_v14 = vpack.c.bf16 %v1510_v18, %v1509_v4 }
 0x2e4   :  { %1619 = vmatmul.bf16.gmra.mxu1 %v1521_v14 }
 0x2e5   :  { %v1486_v44 = vpop.f32.mrf.mxu0 }
 0x2e6   :  { %v1487_v20 = vadd.f32 %v1486_v44, %v1403_v56 }
 0x2e8   :  { %v1511_v23 = vmax.f32 %v1487_v20, 0.0 }
 0x2ed   :  { %v1488_v6 = vpop.f32.mrf.mxu0 }
 0x2ee   :  { %v1489_v7 = vadd.f32 %v1488_v6, %v1403_v56 }
 0x2f0   :  { %v1512_v15 = vmax.f32 %v1489_v7, 0.0 }
 0x2f2   :  { %v1522_v21 = vpack.c.bf16 %v1512_v15, %v1511_v23 }
 0x2f4   :  { %1624 = vmatmul.bf16.gmra.mxu1 %v1522_v21 }
 0x2f5   :  { %v1491_v48 = vpop.f32.mrf.mxu0 }
 0x2f6   :  { %v1492_v24 = vadd.f32 %v1491_v48, %v1403_v56 }
 0x2f8   :  { %v1513_v8 = vmax.f32 %v1492_v24, 0.0 }
 0x2fd   :  { %v1493_v29 = vpop.f32.mrf.mxu0 }
 0x2fe   :  { %v1494_v27 = vadd.f32 %v1493_v29, %v1403_v56 }
 0x300   :  { %v1514_v41 = vmax.f32 %v1494_v27, 0.0 }
 0x302   :  { %v1523_v16 = vpack.c.bf16 %v1514_v41, %v1513_v8 }
 0x304   :  { %1629 = vmatmul.bf16.gmra.mxu1 %v1523_v16 }
 0x305   :  { %v1496_v19 = vpop.f32.mrf.mxu0 }
 0x306   :  { %v1497_v40 = vadd.f32 %v1496_v19, %v1403_v56 }
 0x308   :  { %v1515_v2 = vmax.f32 %v1497_v40, 0.0 }
 0x30d   :  { %v1498_v31 = vpop.f32.mrf.mxu0 }
 0x30e   :  { %v1499_v25 = vadd.f32 %v1498_v31, %v1403_v56 }
 0x310   :  { %v1516_v42 = vmax.f32 %v1499_v25, 0.0 }
 0x312   :  { %v1524_v49 = vpack.c.bf16 %v1516_v42, %v1515_v2 }
 0x314   :  { %1634 = vmatmul.bf16.gmra.mxu1 %v1524_v49 }
 0x321   :  { %v1600_v43 = vpop.f32.mrf.mxu1 }
 0x322   :  { %v1601_v47 = vadd.f32 %v1600_v43, %v1542_v36 }
 0x324   :  { %1640 = vmax.xlane.f32.xlu0 %v1601_v47 }
 0x329   :  { %v1602_v28 = vpop.f32.mrf.mxu1 }
 0x32a   :  { %v1603_v38 = vadd.f32 %v1602_v28, %v1542_v36 }
 0x32c   :  { %1642 = vmax.xlane.f32.xlu0 %v1603_v38 }
 0x331   :  { %v1605_v39 = vpop.f32.mrf.mxu1 }
 0x332   :  { %v1606_v53 = vadd.f32 %v1605_v39, %v1542_v36 }
 0x334   :  { %1644 = vmax.xlane.f32.xlu1 %v1606_v53 }
 0x339   :  { %v1607_v34 = vpop.f32.mrf.mxu1 }
 0x33a   :  { %v1608_v52 = vadd.f32 %v1607_v34, %v1542_v36 }
 0x33c   :  { %1646 = vmax.xlane.f32.xlu1 %v1608_v52 }
 0x341   :  { %v1610_v50 = vpop.f32.mrf.mxu1 }
 0x342   :  { %v1611_v56 = vadd.f32 %v1610_v50, %v1542_v36 }
 0x344   :  { %1648 = vmax.xlane.f32.xlu2 %v1611_v56 }
 0x349   :  { %v1612_v32 = vpop.f32.mrf.mxu1 }
 0x34a   :  { %v1613_v59 = vadd.f32 %v1612_v32, %v1542_v36 }
 0x34c   :  { %1650 = vmax.xlane.f32.xlu2 %v1613_v59 }
 0x351   :  { %v1615_v58 = vpop.f32.mrf.mxu1 }
 0x352   :  { %v2940_v60 = vadd.f32 %v1615_v58, %v1542_v36 }
 0x354   :  { %1652 = vmax.xlane.f32.xlu0 %v2940_v60 }
 0x359   :  { %v1617_v35 = vpop.f32.mrf.mxu1 }
 0x35a   :  { %v2943_v55 = vadd.f32 %v1617_v35, %v1542_v36 }
 0x35c   :  { %1654 = vmax.xlane.f32.xlu1 %v2943_v55 }
 0x361   :  { %v1620_v62 = vpop.f32.mrf.mxu1 }
 0x362   :  { %v2946_v45 = vadd.f32 %v1620_v62, %v1542_v36 }
 0x364   :  { %1656 = vmax.xlane.f32.xlu2 %v2946_v45 }
 0x369   :  { %v1622_v51 = vpop.f32.mrf.mxu1 }
 0x36a   :  { %v2949_v46 = vadd.f32 %v1622_v51, %v1542_v36 }
 0x36c   :  { %1658 = vmax.xlane.f32.xlu0 %v2949_v46 }
 0x371   :  { %v1625_v37 = vpop.f32.mrf.mxu1 }
 0x372   :  { %v2952_v5 = vadd.f32 %v1625_v37, %v1542_v36 }
 0x374   :  { %1660 = vmax.xlane.f32.xlu1 %v2952_v5 }
 0x379   :  { %v1627_v9 = vpop.f32.mrf.mxu1 }
 0x37a   :  { %v2955_v10 = vadd.f32 %v1627_v9, %v1542_v36 }
 0x37c   :  { %1662 = vmax.xlane.f32.xlu2 %v2955_v10 }
 0x381   :  { %v1630_v26 = vpop.f32.mrf.mxu1 }
 0x382   :  { %v2958_v30 = vadd.f32 %v1630_v26, %v1542_v36 }
 0x384   :  { %1664 = vmax.xlane.f32.xlu0 %v2958_v30 }
 0x389   :  { %v1632_v1 = vpop.f32.mrf.mxu1 }
 0x38a   :  { %v2961_v54 = vadd.f32 %v1632_v1, %v1542_v36 }
 0x38c   :  { %1666 = vmax.xlane.f32.xlu1 %v2961_v54 }
 0x391   :  { %v1635_v17 = vpop.f32.mrf.mxu1 }
 0x392   :  { %v2964_v3 = vadd.f32 %v1635_v17, %v1542_v36 }
 0x394   :  { %1668 = vmax.xlane.f32.xlu2 %v2964_v3 }
 0x397   :  { %v1641_v57 = vpop.xlane.xlu0 %1640 }
 0x398   :  { %v2967_v0 = vsub.f32 %v1601_v47, %v1641_v57 }
 0x399   :  { %v1637_v11 = vpop.f32.mrf.mxu1 }
 0x39a   :  { %v1688_v12 = vmul.f32 1.442695, %v2967_v0  ;;  %v2970_v33 = vadd.f32 %v1637_v11, %v1542_v36 }
 0x39c   :  { %2544 = vpow2.f32 %v1688_v12  ;;  %1670 = vmax.xlane.f32.xlu0 %v2970_v33 }
 0x39f   :  { %v1643_v63 = vpop.xlane.xlu0 %1642 }
 0x3a0   :  { %v2973_v13 = vsub.f32 %v1603_v38, %v1643_v63 }
 0x3a2   :  { %v2545_v61 = vpop.eup %2544  ;;  %v1690_v4 = vmul.f32 1.442695, %v2973_v13 }
 0x3a3   :  { %1720 = vadd.xlane.f32.xlu1 %v2545_v61 }
 0x3a4   :  { %2546 = vpow2.f32 %v1690_v4 }
 0x3a7   :  { %v1645_v18 = vpop.xlane.xlu1 %1644 }
 0x3a8   :  { %v2976_v14 = vsub.f32 %v1606_v53, %v1645_v18 }
 0x3aa   :  { %v2547_v44 = vpop.eup %2546  ;;  %v1692_v20 = vmul.f32 1.442695, %v2976_v14 }
 0x3ab   :  { %1722 = vadd.xlane.f32.xlu2 %v2547_v44 }
 0x3ac   :  { %2548 = vpow2.f32 %v1692_v20 }
 0x3af   :  { %v1647_v6 = vpop.xlane.xlu1 %1646 }
 0x3b0   :  { %v2979_v7 = vsub.f32 %v1608_v52, %v1647_v6 }
 0x3b2   :  { %v2549_v23 = vpop.eup %2548  ;;  %v1694_v15 = vmul.f32 1.442695, %v2979_v7 }
 0x3b3   :  { %1724 = vadd.xlane.f32.xlu0 %v2549_v23 }
 0x3b4   :  { %2550 = vpow2.f32 %v1694_v15 }
 0x3b7   :  { %v1649_v21 = vpop.xlane.xlu2 %1648 }
 0x3b8   :  { %v2982_v48 = vsub.f32 %v1611_v56, %v1649_v21 }
 0x3ba   :  { %v2551_v24 = vpop.eup %2550  ;;  %v1696_v29 = vmul.f32 1.442695, %v2982_v48 }
 0x3bb   :  { %1726 = vadd.xlane.f32.xlu1 %v2551_v24 }
 0x3bc   :  { %2552 = vpow2.f32 %v1696_v29 }
 0x3bf   :  { %v1651_v27 = vpop.xlane.xlu2 %1650 }
 0x3c0   :  { %v2985_v8 = vsub.f32 %v1613_v59, %v1651_v27 }
 0x3c2   :  { %v2553_v41 = vpop.eup %2552  ;;  %v1698_v16 = vmul.f32 1.442695, %v2985_v8 }
 0x3c3   :  { %1728 = vadd.xlane.f32.xlu2 %v2553_v41 }
 0x3c4   :  { %2554 = vpow2.f32 %v1698_v16 }
 0x3c7   :  { %v1653_v19 = vpop.xlane.xlu0 %1652 }
 0x3c8   :  { %v2989_v40 = vsub.f32 %v2940_v60, %v1653_v19 }
 0x3ca   :  { %v2555_v31 = vpop.eup %2554  ;;  %v1700_v25 = vmul.f32 1.442695, %v2989_v40 }
 0x3cb   :  { %1730 = vadd.xlane.f32.xlu0 %v2555_v31 }
 0x3cc   :  { %2556 = vpow2.f32 %v1700_v25 }
 0x3cf   :  { %v1655_v2 = vpop.xlane.xlu1 %1654 }
 0x3d0   :  { %v2993_v42 = vsub.f32 %v2943_v55, %v1655_v2 }
 0x3d2   :  { %v2557_v49 = vpop.eup %2556  ;;  %v1702_v22 = vmul.f32 1.442695, %v2993_v42 }
 0x3d3   :  { %1732 = vadd.xlane.f32.xlu1 %v2557_v49 }
 0x3d4   :  { %2558 = vpow2.f32 %v1702_v22 }
 0x3d7   :  { %v1657_v36 = vpop.xlane.xlu2 %1656 }
 0x3d8   :  { %v2997_v43 = vsub.f32 %v2946_v45, %v1657_v36 }
 0x3da   :  { %v2559_v47 = vpop.eup %2558  ;;  %v1704_v28 = vmul.f32 1.442695, %v2997_v43 }
 0x3db   :  { %1734 = vadd.xlane.f32.xlu2 %v2559_v47 }
 0x3dc   :  { %2560 = vpow2.f32 %v1704_v28 }
 0x3df   :  { %v1659_v38 = vpop.xlane.xlu0 %1658 }
 0x3e0   :  { %v3001_v39 = vsub.f32 %v2949_v46, %v1659_v38 }
 0x3e2   :  { %v2561_v53 = vpop.eup %2560  ;;  %v1706_v34 = vmul.f32 1.442695, %v3001_v39 }
 0x3e3   :  { %1736 = vadd.xlane.f32.xlu0 %v2561_v53 }
 0x3e4   :  { %2562 = vpow2.f32 %v1706_v34 }
 0x3e7   :  { %v1661_v52 = vpop.xlane.xlu1 %1660 }
 0x3e8   :  { %v3005_v50 = vsub.f32 %v2952_v5, %v1661_v52 }
 0x3ea   :  { %v2563_v56 = vpop.eup %2562  ;;  %v1708_v32 = vmul.f32 1.442695, %v3005_v50 }
 0x3eb   :  { %1738 = vadd.xlane.f32.xlu1 %v2563_v56 }
 0x3ec   :  { %2564 = vpow2.f32 %v1708_v32 }
 0x3ef   :  { %v1663_v59 = vpop.xlane.xlu2 %1662 }
 0x3f0   :  { %v3009_v58 = vsub.f32 %v2955_v10, %v1663_v59 }
 0x3f2   :  { %v2565_v60 = vpop.eup %2564  ;;  %v1710_v35 = vmul.f32 1.442695, %v3009_v58 }
 0x3f3   :  { %1740 = vadd.xlane.f32.xlu2 %v2565_v60 }
 0x3f4   :  { %2566 = vpow2.f32 %v1710_v35 }
 0x3f7   :  { %v1665_v55 = vpop.xlane.xlu0 %1664 }
 0x3f8   :  { %v3013_v62 = vsub.f32 %v2958_v30, %v1665_v55 }
 0x3fa   :  { %v2567_v45 = vpop.eup %2566  ;;  %v1712_v51 = vmul.f32 1.442695, %v3013_v62 }
 0x3fb   :  { %1742 = vadd.xlane.f32.xlu0 %v2567_v45 }
 0x3fc   :  { %2568 = vpow2.f32 %v1712_v51 }
 0x3ff   :  { %v1667_v46 = vpop.xlane.xlu1 %1666 }
 0x400   :  { %v3017_v37 = vsub.f32 %v2961_v54, %v1667_v46 }
 0x402   :  { %v2569_v5 = vpop.eup %2568  ;;  %v1714_v9 = vmul.f32 1.442695, %v3017_v37 }
 0x403   :  { %1744 = vadd.xlane.f32.xlu1 %v2569_v5 }
 0x404   :  { %2570 = vpow2.f32 %v1714_v9 }
 0x407   :  { %v1669_v10 = vpop.xlane.xlu2 %1668 }
 0x408   :  { %v3021_v26 = vsub.f32 %v2964_v3, %v1669_v10 }
 0x40a   :  { %v2571_v30 = vpop.eup %2570  ;;  %v1716_v1 = vmul.f32 1.442695, %v3021_v26 }
 0x40b   :  { %1746 = vadd.xlane.f32.xlu2 %v2571_v30 }
 0x40c   :  { %2572 = vpow2.f32 %v1716_v1 }
 0x40f   :  { %v1671_v17 = vpop.xlane.xlu0 %1670 }
 0x410   :  { %v3025_v57 = vsub.f32 %v2970_v33, %v1671_v17 }
 0x412   :  { %v2573_v54 = vpop.eup %2572  ;;  %v1718_v11 = vmul.f32 1.442695, %v3025_v57 }
 0x413   :  { %1748 = vadd.xlane.f32.xlu0 %v2573_v54 }
 0x414   :  { %2574 = vpow2.f32 %v1718_v11 }
 0x416   :  { %v1721_v12 = vpop.xlane.xlu1 %1720 }
 0x417   :  { %2576 = vlog2.f32 %v1721_v12 }
 0x41a   :  { %v2575_v63 = vpop.eup %2574 }
 0x41b   :  { %1750 = vadd.xlane.f32.xlu1 %v2575_v63 }
 0x41d   :  { %v2577_v3 = vpop.eup %2576 }
 0x41e   :  { %v1753_v61 = vmul.f32 0.6931472, %v2577_v3  ;;  %v1723_v4 = vpop.xlane.xlu2 %1722 }
 0x41f   :  { %2578 = vlog2.f32 %v1723_v4 }
 0x420   :  { %v1784_v18 = vsub.f32 %v2967_v0, %v1753_v61 }
 0x422   :  { %1800 = vst [vmem:[#allocation10] sm:$0xff] %v1784_v18 }
 0x425   :  { %v2579_v44 = vpop.eup %2578 }
 0x426   :  { %v1755_v20 = vmul.f32 0.6931472, %v2579_v44  ;;  %v1725_v33 = vpop.xlane.xlu0 %1724 }
 0x427   :  { %2580 = vlog2.f32 %v1725_v33 }
 0x428   :  { %v1785_v6 = vsub.f32 %v2973_v13, %v1755_v20 }
 0x42a   :  { %1801 = vst [vmem:[#allocation10 + $0x8] sm:$0xff] %v1785_v6 }
 0x42d   :  { %v2581_v23 = vpop.eup %2580 }
 0x42e   :  { %v1757_v15 = vmul.f32 0.6931472, %v2581_v23  ;;  %v1727_v21 = vpop.xlane.xlu1 %1726 }
 0x42f   :  { %2582 = vlog2.f32 %v1727_v21 }
 0x430   :  { %v1786_v24 = vsub.f32 %v2976_v14, %v1757_v15 }
 0x432   :  { %1802 = vst [vmem:[#allocation10 + $0x10] sm:$0xff] %v1786_v24 }
 0x435   :  { %v2583_v29 = vpop.eup %2582 }
 0x436   :  { %v1759_v27 = vmul.f32 0.6931472, %v2583_v29  ;;  %v1729_v41 = vpop.xlane.xlu2 %1728 }
 0x437   :  { %2584 = vlog2.f32 %v1729_v41 }
 0x438   :  { %v1787_v0 = vsub.f32 %v2979_v7, %v1759_v27 }
 0x43a   :  { %1803 = vst [vmem:[#allocation10 + $0x18] sm:$0xff] %v1787_v0 }
 0x43d   :  { %v2585_v16 = vpop.eup %2584 }
 0x43e   :  { %v1761_v19 = vmul.f32 0.6931472, %v2585_v16  ;;  %v1731_v31 = vpop.xlane.xlu0 %1730 }
 0x43f   :  { %2586 = vlog2.f32 %v1731_v31 }
 0x440   :  { %v1788_v13 = vsub.f32 %v2982_v48, %v1761_v19 }
 0x442   :  { %1804 = vst [vmem:[#allocation10 + $0x20] sm:$0xff] %v1788_v13 }
 0x445   :  { %v2587_v25 = vpop.eup %2586 }
 0x446   :  { %v1763_v2 = vmul.f32 0.6931472, %v2587_v25  ;;  %v1733_v49 = vpop.xlane.xlu1 %1732 }
 0x447   :  { %2588 = vlog2.f32 %v1733_v49 }
 0x448   :  { %v1789_v14 = vsub.f32 %v2985_v8, %v1763_v2 }
 0x44a   :  { %1805 = vst [vmem:[#allocation10 + $0x28] sm:$0xff] %v1789_v14 }
 0x44d   :  { %v2589_v22 = vpop.eup %2588 }
 0x44e   :  { %v1765_v36 = vmul.f32 0.6931472, %v2589_v22  ;;  %v1735_v47 = vpop.xlane.xlu2 %1734 }
 0x44f   :  { %2590 = vlog2.f32 %v1735_v47 }
 0x450   :  { %v1790_v7 = vsub.f32 %v2989_v40, %v1765_v36 }
 0x452   :  { %1806 = vst [vmem:[#allocation10 + $0x30] sm:$0xff] %v1790_v7 }
 0x455   :  { %v2591_v28 = vpop.eup %2590 }
 0x456   :  { %v1767_v38 = vmul.f32 0.6931472, %v2591_v28  ;;  %v1737_v53 = vpop.xlane.xlu0 %1736 }
 0x457   :  { %2592 = vlog2.f32 %v1737_v53 }
 0x458   :  { %v1791_v48 = vsub.f32 %v2993_v42, %v1767_v38 }
 0x45a   :  { %1807 = vst [vmem:[#allocation10 + $0x38] sm:$0xff] %v1791_v48 }
 0x45d   :  { %v2593_v34 = vpop.eup %2592 }
 0x45e   :  { %v1769_v52 = vmul.f32 0.6931472, %v2593_v34  ;;  %v1739_v56 = vpop.xlane.xlu1 %1738 }
 0x45f   :  { %2594 = vlog2.f32 %v1739_v56 }
 0x460   :  { %v1792_v8 = vsub.f32 %v2997_v43, %v1769_v52 }
 0x462   :  { %1808 = vst [vmem:[#allocation10 + $0x40] sm:$0xff] %v1792_v8 }
 0x465   :  { %v2595_v32 = vpop.eup %2594 }
 0x466   :  { %v1771_v59 = vmul.f32 0.6931472, %v2595_v32  ;;  %v1741_v60 = vpop.xlane.xlu2 %1740 }
 0x467   :  { %2596 = vlog2.f32 %v1741_v60 }
 0x468   :  { %v1793_v40 = vsub.f32 %v3001_v39, %v1771_v59 }
 0x46a   :  { %1809 = vst [vmem:[#allocation10 + $0x48] sm:$0xff] %v1793_v40 }
 0x46d   :  { %v2597_v35 = vpop.eup %2596 }
 0x46e   :  { %v1773_v55 = vmul.f32 0.6931472, %v2597_v35  ;;  %v1743_v45 = vpop.xlane.xlu0 %1742 }
 0x46f   :  { %2598 = vlog2.f32 %v1743_v45 }
 0x470   :  { %v1794_v42 = vsub.f32 %v3005_v50, %v1773_v55 }
 0x472   :  { %1810 = vst [vmem:[#allocation10 + $0x50] sm:$0xff] %v1794_v42 }
 0x475   :  { %v2599_v51 = vpop.eup %2598 }
 0x476   :  { %v1775_v46 = vmul.f32 0.6931472, %v2599_v51  ;;  %v1745_v5 = vpop.xlane.xlu1 %1744 }
 0x477   :  { %2600 = vlog2.f32 %v1745_v5 }
 0x478   :  { %v1795_v43 = vsub.f32 %v3009_v58, %v1775_v46 }
 0x47a   :  { %1811 = vst [vmem:[#allocation10 + $0x58] sm:$0xff] %v1795_v43 }
 0x47d   :  { %v2601_v9 = vpop.eup %2600 }
 0x47e   :  { %v1777_v10 = vmul.f32 0.6931472, %v2601_v9  ;;  %v1747_v30 = vpop.xlane.xlu2 %1746 }
 0x47f   :  { %2602 = vlog2.f32 %v1747_v30 }
 0x480   :  { %v1796_v39 = vsub.f32 %v3013_v62, %v1777_v10 }
 0x482   :  { %1812 = vst [vmem:[#allocation10 + $0x60] sm:$0xff] %v1796_v39 }
 0x485   :  { %v2603_v1 = vpop.eup %2602 }
 0x486   :  { %v1779_v17 = vmul.f32 0.6931472, %v2603_v1  ;;  %v1749_v54 = vpop.xlane.xlu0 %1748 }
 0x487   :  { %2604 = vlog2.f32 %v1749_v54 }
 0x488   :  { %v1797_v50 = vsub.f32 %v3017_v37, %v1779_v17 }
 0x48a   :  { %1813 = vst [vmem:[#allocation10 + $0x68] sm:$0xff] %v1797_v50 }
 0x48d   :  { %v2605_v11 = vpop.eup %2604 }
 0x48e   :  { %v1781_v12 = vmul.f32 0.6931472, %v2605_v11  ;;  %v1751_v63 = vpop.xlane.xlu1 %1750 }
 0x48f   :  { %2606 = vlog2.f32 %v1751_v63 }
 0x490   :  { %v1798_v58 = vsub.f32 %v3021_v26, %v1781_v12 }
 0x492   :  { %1814 = vst [vmem:[#allocation10 + $0x70] sm:$0xff] %v1798_v58 }
 0x495   :  { %v2607_v62 = vpop.eup %2606 }
 0x496   :  { %v1783_v3 = vmul.f32 0.6931472, %v2607_v62 }
 0x498   :  { %v1799_v37 = vsub.f32 %v3025_v57, %v1783_v3 }
 0x49a   :  { %1815 = vst [vmem:[#allocation10 + $0x78] sm:$0xff] %v1799_v37 }
 0x49b   :  { %1828 = dma.vmem_to_hbm [thread:$0]  %s1821_s3, 2048, %s1823_s13, [#allocation4], %s2746_s14, %s2746_s14, %s2747_s15  }
 0x49c   :  { %2735 = dma.done.wait [#allocation4], 2048  }
 0x49d   :  { %2736 = vsyncadd [#allocation4], 4294965248 }
 0x49e   :  { %1833 = vsyncpa [#allocation3], 1 }
 0x49f   :  { %1834 = vsyncpa [#allocation6], 1 }
 0x4a0   :  { %1835 = vsyncpa [#allocation9], 1 }
 0x4a1   :  { %1836 = vsyncpa [#allocation4], 1 }

</bundles_post_ra>
